<compile_context>
chip_gen: v7x
topology: tpu7x:2x2x1
jax: 0.10.0
libtpu: 0.0.40
codegen_flags: <defaults>
</compile_context>

<pallas_src>
import functools

import jax
import jax.numpy as jnp
import numpy as np
from jax.experimental import pallas as pl
from jax.experimental.pallas import tpu as pltpu


# ----------------------------------------------------------------------------
# VMEM budget (generation aware: ~128 MiB on v5e/v6e, 64 MiB on v7x)
# ----------------------------------------------------------------------------
@functools.lru_cache(maxsize=1)
def _vmem_limit_bytes():
    try:
        cap = int(pltpu.get_tpu_info().vmem_capacity_bytes)
    except Exception:
        cap = 64 * 1024 * 1024
    return int(min(cap * 7 // 8, 112 * 1024 * 1024))


# ----------------------------------------------------------------------------
# Pallas kernel 1: folded subpixel conv, deep-K matmuls, depth-to-space ordered out
# ----------------------------------------------------------------------------
def _subpix_kernel(x_ref, w_ref, o_ref, *, th, Wc):
    # x_ref: (1, Hc+2, Wc, 3*Cin)  column-stacked, row-padded input (bf16), resident
    #        per batch element (constant block index across the r / t grid axes).
    # w_ref: (1, 3, 3*Cin, s*32)   folded weights for this subpixel row (bf16),
    #        resident across the inner row-tile axis.
    # o_ref: (th, 1, Wc, s*32)     coarse rows [t*th, (t+1)*th) at subpixel row r.
    t = pl.program_id(2)
    base = t * th
    r0 = pl.multiple_of(base, th) if th % 8 == 0 else base
    K3 = x_ref.shape[-1]
    Co = o_ref.shape[-1]
    acc = jnp.zeros((th * Wc, Co), jnp.float32)
    for a in range(3):                       # 3 row taps, each one K = 3*Cin matmul
        xs = x_ref[0, pl.ds(r0 + a, th)].reshape(th * Wc, K3)
        acc = acc + jnp.dot(xs, w_ref[0, a], preferred_element_type=jnp.float32)
    o_ref[...] = acc.reshape(th, 1, Wc, Co).astype(o_ref.dtype)


def _pick_conv_rows(Hc, Wc, Co, acc_cap_bytes=4 << 20, cap_rows=256):
    cap = max(1, min(cap_rows, acc_cap_bytes // max(1, Wc * Co * 4)))
    best = 1
    for d in range(1, min(Hc, cap) + 1):
        if Hc % d == 0:
            best = d
    return best


def subpixel_conv(x_cols, w, s):
    # x_cols: (N, Hc+2, Wc, 3*Cin) bf16;  w: (s, 3, 3*Cin, s*32) bf16
    # returns (N*Hc, s, Wc, s*32) bf16 -- already in depth-to-space order, so the
    # flatten to (N, Hc*s, Wc*s*32) in the wrapper is a free contiguous reshape.
    N, Hp, Wc, K3 = x_cols.shape
    Hc = Hp - 2
    Co = w.shape[-1]
    th = _pick_conv_rows(Hc, Wc, Co)
    nT = Hc // th
    kernel = functools.partial(_subpix_kernel, th=th, Wc=Wc)
    return pl.pallas_call(
        kernel,
        out_shape=jax.ShapeDtypeStruct((N * Hc, s, Wc, Co), jnp.bfloat16),
        grid=(N, s, nT),
        in_specs=[
            pl.BlockSpec((1, Hp, Wc, K3), lambda n, r, t: (n, 0, 0, 0)),
            pl.BlockSpec((1, 3, K3, Co), lambda n, r, t: (r, 0, 0, 0)),
        ],
        out_specs=pl.BlockSpec((th, 1, Wc, Co),
                               lambda n, r, t: (n * nT + t, r, 0, 0)),
        compiler_params=pltpu.CompilerParams(
            dimension_semantics=("parallel", "parallel", "parallel"),
            vmem_limit_bytes=_vmem_limit_bytes()),
    )(x_cols, w)


# ----------------------------------------------------------------------------
# Pallas kernel 2a: per-tile BN partial statistics + bf16 branch sum
# ----------------------------------------------------------------------------
def _bn_stats_kernel(x1_ref, x2_ref, x3_ref, sum_ref, stat_ref):
    # x*_ref : (1, th2, tf) bf16 branch tiles (lane-dense W*C flattened layout)
    # sum_ref: (1, th2, tf) bf16 branch sum (re-used by bn_apply -> no triple re-read)
    # stat_ref: (1, 1, 2, tf) f32 [0]=sum, [1]=sum of squares over the tile's rows
    s = (x1_ref[0].astype(jnp.float32)
         + x2_ref[0].astype(jnp.float32)
         + x3_ref[0].astype(jnp.float32))          # (th2, tf) in f32
    sum_ref[0] = s.astype(sum_ref.dtype)
    stat_ref[0, 0, 0, :] = jnp.sum(s, axis=0)
    stat_ref[0, 0, 1, :] = jnp.sum(s * s, axis=0)


def bn_stats(d1f, d2f, d3f, th2, tf):
    N, Hout, F = d1f.shape
    nT, nF = Hout // th2, F // tf
    return pl.pallas_call(
        _bn_stats_kernel,
        out_shape=(jax.ShapeDtypeStruct((N, Hout, F), jnp.bfloat16),
                   jax.ShapeDtypeStruct((N, nT, 2, F), jnp.float32)),
        grid=(N, nT, nF),
        in_specs=[pl.BlockSpec((1, th2, tf), lambda n, t, f: (n, t, f))] * 3,
        out_specs=(pl.BlockSpec((1, th2, tf), lambda n, t, f: (n, t, f)),
                   pl.BlockSpec((1, 1, 2, tf), lambda n, t, f: (n, t, 0, f))),
        compiler_params=pltpu.CompilerParams(
            dimension_semantics=("parallel", "parallel", "parallel"),
            vmem_limit_bytes=_vmem_limit_bytes()),
    )(d1f, d2f, d3f)


# ----------------------------------------------------------------------------
# Pallas kernel 2b: normalize + affine + ReLU on the pre-summed branches
# ----------------------------------------------------------------------------
def _bn_apply_kernel(s_ref, sc_ref, sh_ref, o_ref):
    s = s_ref[...].astype(jnp.float32)             # (1, th2, tf)
    y = s * sc_ref[...] + sh_ref[...]              # broadcast (1, tf)
    o_ref[...] = jnp.maximum(y, 0.0)


def bn_apply(sum_f, scale_flat, shift_flat, th2, tf):
    N, Hout, F = sum_f.shape
    nT, nF = Hout // th2, F // tf
    return pl.pallas_call(
        _bn_apply_kernel,
        out_shape=jax.ShapeDtypeStruct((N, Hout, F), jnp.float32),
        grid=(N, nT, nF),
        in_specs=[pl.BlockSpec((1, th2, tf), lambda n, t, f: (n, t, f)),
                  pl.BlockSpec((1, tf), lambda n, t, f: (0, f)),
                  pl.BlockSpec((1, tf), lambda n, t, f: (0, f))],
        out_specs=pl.BlockSpec((1, th2, tf), lambda n, t, f: (n, t, f)),
        compiler_params=pltpu.CompilerParams(
            dimension_semantics=("parallel", "parallel", "parallel"),
            vmem_limit_bytes=_vmem_limit_bytes()),
    )(sum_f, scale_flat, shift_flat)


# ----------------------------------------------------------------------------
# Host-side, one-time parameter preparation (NOT inside jit / not traced).
# ----------------------------------------------------------------------------
def _fold_deconv_and_fusion(w_t, wf_i, s):
    # w_t:  (Cin, 32, 2s, 2s) PyTorch ConvTranspose2d weight (in, out, kH, kW)
    # wf_i: (32, 32) fusion 1x1 weight slice (out_ch, in_ch) for this branch
    # Returns (s, 3, 3*Cin, s*32): per subpixel row r, a 3-row-tap conv whose
    # contraction dim stacks (col tap b, cin) and whose output dim stacks
    # (subpixel col c, out ch).  (deconv -> 1x1 fusion) == this conv on the
    # zero-padded input followed by a *free* depth-to-space reshape.
    w_t = np.asarray(w_t, np.float32)
    wf_i = np.asarray(wf_i, np.float32)
    Cin, Cout, K, _ = w_t.shape
    w_c = np.einsum("po,ioyx->ipyx", wf_i, w_t)     # compose 1x1 fusion into deconv
    p = s // 2
    w_sub = np.zeros((s, 3, 3 * Cin, s * Cout), np.float32)
    for r in range(s):
        for di in (-1, 0, 1):
            ky = r - di * s + p
            if not (0 <= ky < K):
                continue
            for dj in (-1, 0, 1):
                for c in range(s):
                    kx = c - dj * s + p
                    if not (0 <= kx < K):
                        continue
                    w_sub[r, di + 1,
                          (dj + 1) * Cin:(dj + 2) * Cin,
                          c * Cout:(c + 1) * Cout] = w_c[:, :, ky, kx]
    return w_sub


def prepare_decoder_params(params):
    """Host-side weight folding (numpy).  Call once, outside any jit."""
    wf = np.asarray(params["wf"], np.float32).reshape(32, 96)
    folded = {}
    for name, wkey, s, lo in (("w1", "w1", 2, 0), ("w2", "w2", 4, 32), ("w3", "w3", 8, 64)):
        w_sub = _fold_deconv_and_fusion(params[wkey], wf[:, lo:lo + 32], s)
        folded[name] = jnp.asarray(w_sub, jnp.bfloat16)
    # Deconv / fusion biases intentionally dropped: per-channel constants cancel
    # exactly under train-mode BatchNorm (they only shift the batch mean).
    folded["gamma"] = jnp.asarray(params["gamma"], jnp.float32)
    folded["beta"] = jnp.asarray(params["beta"], jnp.float32)
    return folded


# ----------------------------------------------------------------------------
# Wrapper glue (jittable)
# ----------------------------------------------------------------------------
def _pick_row_tile(H, cap=256):
    if H <= cap:
        return H
    best = None
    for d in range(8, cap + 1, 8):
        if H % d == 0:
            best = d
    return best if best is not None else H


def _pick_lane_tile(F, cap=32768):
    if F <= cap:
        return F
    best = None
    for d in range(128, cap + 1, 128):
        if F % d == 0:
            best = d
    return best if best is not None else F


def _finalize_bn(stats, gamma, beta, Wout, P):
    s = jnp.sum(stats, axis=(0, 1))                 # (2, F)
    s = s.reshape(2, Wout, 32).sum(axis=1)          # (2, 32)
    mean = s[0] / P
    var = s[1] / P - mean * mean                    # biased variance (PyTorch BN fwd)
    scale = gamma * jax.lax.rsqrt(var + 1e-5)
    shift = beta - mean * scale
    F = Wout * 32
    return jnp.tile(scale, Wout).reshape(1, F), jnp.tile(shift, Wout).reshape(1, F)


def image_decoder_forward(I0, I1, I2, fp):
    # I0: (N,64,H,W)  I1: (N,64,H/2,W/2)  I2: (N,128,H/4,W/4)  ->  (N,32,2H,2W)
    cout = 32

    def prep(x):
        # NCHW -> NHWC bf16, zero-pad 1 row/col, then stack the 3 column taps into
        # the channel dim so kernel 1 contracts over K = 3*Cin per row tap.
        x = jnp.transpose(x, (0, 2, 3, 1)).astype(jnp.bfloat16)
        Wc = x.shape[2]
        xp = jnp.pad(x, ((0, 0), (1, 1), (1, 1), (0, 0)))
        return jnp.concatenate([xp[:, :, b:b + Wc, :] for b in range(3)], axis=-1)

    branches = []
    for x, wkey, s in ((I0, "w1", 2), (I1, "w2", 4), (I2, "w3", 8)):
        N, _, Hc, _ = x.shape
        ysub = subpixel_conv(prep(x), fp[wkey], s)   # (N*Hc, s, Wc, s*32), d2s order
        F = ysub.shape[2] * ysub.shape[3]
        branches.append(ysub.reshape(N, Hc * s, F))  # free contiguous reshape
    d1f, d2f, d3f = branches

    N, Hout, F = d1f.shape
    Wout = F // cout
    th2 = _pick_row_tile(Hout)
    tf = _pick_lane_tile(F)

    sum_f, stats = bn_stats(d1f, d2f, d3f, th2, tf)
    scale_flat, shift_flat = _finalize_bn(stats, fp["gamma"], fp["beta"],
                                          Wout, N * Hout * Wout)
    outf = bn_apply(sum_f, scale_flat, shift_flat, th2, tf)

    out = outf.reshape(N, Hout, Wout, cout)
    # TODO(synk): final NHWC->NCHW transpose stays in XLA (see header note).
    return jnp.transpose(out, (0, 3, 1, 2))                        # NCHW


# ----------------------------------------------------------------------------
# Pure-JAX full-fidelity reference (with biases) for numerical verification
# ----------------------------------------------------------------------------
def _conv_transpose_ref(x, w, b, s, p):
    K = w.shape[-1]
    w_conv = jnp.transpose(jnp.flip(w, axis=(2, 3)), (1, 0, 2, 3))   # (Cout, Cin, K, K)
    y = jax.lax.conv_general_dilated(
        x, w_conv, window_strides=(1, 1),
        padding=[(K - 1 - p, K - 1 - p)] * 2,
        lhs_dilation=(s, s),
        dimension_numbers=("NCHW", "OIHW", "NCHW"),
        precision=jax.lax.Precision.HIGHEST)
    return y + b[None, :, None, None]


def image_decoder_ref(I0, I1, I2, params):
    d1 = _conv_transpose_ref(I0, params["w1"], params["b1"], 2, 1)
    d2 = _conv_transpose_ref(I1, params["w2"], params["b2"], 4, 2)
    d3 = _conv_transpose_ref(I2, params["w3"], params["b3"], 8, 4)
    cat = jnp.concatenate([d1, d2, d3], axis=1)
    wf = params["wf"].reshape(32, 96)
    y = jnp.einsum("nchw,oc->nohw", cat, wf,
                   precision=jax.lax.Precision.HIGHEST) + params["bf"][None, :, None, None]
    mean = jnp.mean(y, axis=(0, 2, 3), keepdims=True)
    var = jnp.mean(jnp.square(y - mean), axis=(0, 2, 3), keepdims=True)
    y_hat = (y - mean) * jax.lax.rsqrt(var + 1e-5)
    out = y_hat * params["gamma"][None, :, None, None] + params["beta"][None, :, None, None]
    return jnp.maximum(out, 0.0)


# ----------------------------------------------------------------------------
if __name__ == "__main__":
    key = jax.random.PRNGKey(0)
    ks = jax.random.split(key, 16)

    params = {
        # ConvTranspose2d weights use PyTorch layout (Cin, Cout, K, K).
        "w1": jax.random.normal(ks[0], (64, 32, 4, 4), jnp.float32) * 0.05,
        "b1": jax.random.normal(ks[1], (32,), jnp.float32) * 0.05,
        "w2": jax.random.normal(ks[2], (64, 32, 8, 8), jnp.float32) * 0.05,
        "b2": jax.random.normal(ks[3], (32,), jnp.float32) * 0.05,
        "w3": jax.random.normal(ks[4], (128, 32, 16, 16), jnp.float32) * 0.05,
        "b3": jax.random.normal(ks[5], (32,), jnp.float32) * 0.05,
        # 1x1 fusion Conv2d weight (Cout, Cin, 1, 1) and BatchNorm2d(32) affine params.
        "wf": jax.random.normal(ks[6], (32, 96, 1, 1), jnp.float32) * 0.05,
        "bf": jax.random.normal(ks[7], (32,), jnp.float32) * 0.05,
        "gamma": 1.0 + 0.1 * jax.random.normal(ks[8], (32,), jnp.float32),
        "beta": 0.1 * jax.random.normal(ks[9], (32,), jnp.float32),
    }

    # Small shapes consistent with the module: all deconvs upsample to 16x16.
    I0 = jax.random.normal(ks[10], (2, 64, 8, 8), jnp.float32)
    I1 = jax.random.normal(ks[11], (2, 64, 4, 4), jnp.float32)
    I2 = jax.random.normal(ks[12], (2, 128, 2, 2), jnp.float32)

    folded = prepare_decoder_params(params)          # host-side, outside jit
    fwd = jax.jit(image_decoder_forward)

    out = jax.block_until_ready(fwd(I0, I1, I2, folded))
    assert out.shape == (2, 32, 16, 16), out.shape

    ref = jax.block_until_ready(image_decoder_ref(I0, I1, I2, params))
    if not jnp.allclose(out, ref, rtol=3e-2, atol=3e-2):
        max_err = float(jnp.max(jnp.abs(out - ref)))
        raise AssertionError(f"Pallas output mismatch vs reference, max abs err = {max_err}")

    print("KERNEL_OK")
</pallas_src>

<mosaic_0001>
module attributes {stable_mosaic.version = 11 : i64} {
  func.func @_subpix_kernel(%arg0: i32, %arg1: i32, %arg2: i32, %arg3: memref<1x10x8x192xbf16, #tpu.memory_space<vmem>>, %arg4: memref<1x3x192x64xbf16, #tpu.memory_space<vmem>>, %arg5: memref<8x1x8x64xbf16, #tpu.memory_space<vmem>>) attributes {dimension_semantics = [#tpu.dimension_semantics<parallel>, #tpu.dimension_semantics<parallel>, #tpu.dimension_semantics<parallel>], iteration_bounds = array<i64: 2, 2, 1>, scalar_prefetch = 0 : i64, scratch_operands = 0 : i64, tpu.core_type = #tpu.core_type<tc>, window_params = [{transform_indices = @transform_0, window_bounds = array<i64: 1, 10, 8, 192>}, {transform_indices = @transform_1, window_bounds = array<i64: 1, 3, 192, 64>}, {transform_indices = @transform_2, window_bounds = array<i64: 8, 1, 8, 64>}]} {
    %c8_i32 = arith.constant 8 : i32
    %0 = arith.muli %arg2, %c8_i32 : i32
    %1 = tpu.assume_multiple %0, 8 : i32
    %cst = arith.constant 0.000000e+00 : f32
    %2 = vector.broadcast %cst : f32 to vector<64x64xf32>
    %c0_i32 = arith.constant 0 : i32
    %3 = arith.addi %1, %c0_i32 : i32
    %c0 = arith.constant 0 : index
    %4 = arith.index_cast %3 : i32 to index
    %c0_0 = arith.constant 0 : index
    %c0_1 = arith.constant 0 : index
    %5 = vector.load %arg3[%c0, %4, %c0_0, %c0_1] : memref<1x10x8x192xbf16, #tpu.memory_space<vmem>>, vector<1x8x8x192xbf16>
    %6 = vector.shape_cast %5 : vector<1x8x8x192xbf16> to vector<8x8x192xbf16>
    %7 = vector.shape_cast %6 : vector<8x8x192xbf16> to vector<64x192xbf16>
    %c0_2 = arith.constant 0 : index
    %c0_3 = arith.constant 0 : index
    %c0_4 = arith.constant 0 : index
    %c0_5 = arith.constant 0 : index
    %8 = vector.load %arg4[%c0_2, %c0_3, %c0_4, %c0_5] : memref<1x3x192x64xbf16, #tpu.memory_space<vmem>>, vector<1x1x192x64xbf16>
    %9 = vector.shape_cast %8 : vector<1x1x192x64xbf16> to vector<192x64xbf16>
    %cst_6 = arith.constant dense<0.000000e+00> : vector<64x64xf32>
    %10 = tpu.matmul %7, %9, %cst_6 {dimension_numbers = #tpu.dot_dimension_numbers<[1], [0], [0], [1], [0, 0, 1, 1], [], []>} : vector<64x192xbf16>, vector<192x64xbf16>, vector<64x64xf32> -> vector<64x64xf32>
    %11 = arith.addf %2, %10 : vector<64x64xf32>
    %c1_i32 = arith.constant 1 : i32
    %12 = arith.addi %1, %c1_i32 : i32
    %c0_7 = arith.constant 0 : index
    %13 = arith.index_cast %12 : i32 to index
    %c0_8 = arith.constant 0 : index
    %c0_9 = arith.constant 0 : index
    %14 = vector.load %arg3[%c0_7, %13, %c0_8, %c0_9] : memref<1x10x8x192xbf16, #tpu.memory_space<vmem>>, vector<1x8x8x192xbf16>
    %15 = vector.shape_cast %14 : vector<1x8x8x192xbf16> to vector<8x8x192xbf16>
    %16 = vector.shape_cast %15 : vector<8x8x192xbf16> to vector<64x192xbf16>
    %c0_10 = arith.constant 0 : index
    %c1 = arith.constant 1 : index
    %c0_11 = arith.constant 0 : index
    %c0_12 = arith.constant 0 : index
    %17 = vector.load %arg4[%c0_10, %c1, %c0_11, %c0_12] : memref<1x3x192x64xbf16, #tpu.memory_space<vmem>>, vector<1x1x192x64xbf16>
    %18 = vector.shape_cast %17 : vector<1x1x192x64xbf16> to vector<192x64xbf16>
    %cst_13 = arith.constant dense<0.000000e+00> : vector<64x64xf32>
    %19 = tpu.matmul %16, %18, %cst_13 {dimension_numbers = #tpu.dot_dimension_numbers<[1], [0], [0], [1], [0, 0, 1, 1], [], []>} : vector<64x192xbf16>, vector<192x64xbf16>, vector<64x64xf32> -> vector<64x64xf32>
    %20 = arith.addf %11, %19 : vector<64x64xf32>
    %c2_i32 = arith.constant 2 : i32
    %21 = arith.addi %1, %c2_i32 : i32
    %c0_14 = arith.constant 0 : index
    %22 = arith.index_cast %21 : i32 to index
    %c0_15 = arith.constant 0 : index
    %c0_16 = arith.constant 0 : index
    %23 = vector.load %arg3[%c0_14, %22, %c0_15, %c0_16] : memref<1x10x8x192xbf16, #tpu.memory_space<vmem>>, vector<1x8x8x192xbf16>
    %24 = vector.shape_cast %23 : vector<1x8x8x192xbf16> to vector<8x8x192xbf16>
    %25 = vector.shape_cast %24 : vector<8x8x192xbf16> to vector<64x192xbf16>
    %c0_17 = arith.constant 0 : index
    %c2 = arith.constant 2 : index
    %c0_18 = arith.constant 0 : index
    %c0_19 = arith.constant 0 : index
    %26 = vector.load %arg4[%c0_17, %c2, %c0_18, %c0_19] : memref<1x3x192x64xbf16, #tpu.memory_space<vmem>>, vector<1x1x192x64xbf16>
    %27 = vector.shape_cast %26 : vector<1x1x192x64xbf16> to vector<192x64xbf16>
    %cst_20 = arith.constant dense<0.000000e+00> : vector<64x64xf32>
    %28 = tpu.matmul %25, %27, %cst_20 {dimension_numbers = #tpu.dot_dimension_numbers<[1], [0], [0], [1], [0, 0, 1, 1], [], []>} : vector<64x192xbf16>, vector<192x64xbf16>, vector<64x64xf32> -> vector<64x64xf32>
    %29 = arith.addf %20, %28 : vector<64x64xf32>
    %30 = vector.shape_cast %29 : vector<64x64xf32> to vector<8x1x8x64xf32>
    %31 = arith.truncf %30 : vector<8x1x8x64xf32> to vector<8x1x8x64xbf16>
    %c0_21 = arith.constant 0 : index
    %c0_22 = arith.constant 0 : index
    %c0_23 = arith.constant 0 : index
    %c0_24 = arith.constant 0 : index
    %32 = vector.load %arg5[%c0_21, %c0_22, %c0_23, %c0_24] : memref<8x1x8x64xbf16, #tpu.memory_space<vmem>>, vector<8x1x8x64xbf16>
    tpu.vector_store %arg5[%c0_21, %c0_22, %c0_23, %c0_24], %31 {strides = array<i32>} : memref<8x1x8x64xbf16, #tpu.memory_space<vmem>>, vector<8x1x8x64xbf16>,
    return
  }
  func.func @transform_0(%arg0: i32, %arg1: i32, %arg2: i32) -> (i32, i32, i32, i32) {
    %c0_i32 = arith.constant 0 : i32
    %c0_i32_0 = arith.constant 0 : i32
    %c0_i32_1 = arith.constant 0 : i32
    %c0_i32_2 = arith.constant 0 : i32
    return %arg0, %c0_i32, %c0_i32_0, %c0_i32_1 : i32, i32, i32, i32
  }
  func.func @transform_1(%arg0: i32, %arg1: i32, %arg2: i32) -> (i32, i32, i32, i32) {
    %c0_i32 = arith.constant 0 : i32
    %c0_i32_0 = arith.constant 0 : i32
    %c0_i32_1 = arith.constant 0 : i32
    %c0_i32_2 = arith.constant 0 : i32
    return %arg1, %c0_i32, %c0_i32_0, %c0_i32_1 : i32, i32, i32, i32
  }
  func.func @transform_2(%arg0: i32, %arg1: i32, %arg2: i32) -> (i32, i32, i32, i32) {
    %c1_i32 = arith.constant 1 : i32
    %0 = arith.muli %arg0, %c1_i32 : i32
    %1 = arith.addi %0, %arg2 : i32
    %c0_i32 = arith.constant 0 : i32
    %c0_i32_0 = arith.constant 0 : i32
    %c0_i32_1 = arith.constant 0 : i32
    return %1, %arg1, %c0_i32, %c0_i32_0 : i32, i32, i32, i32
  }
}

module attributes {stable_mosaic.version = 11 : i64} {
  func.func @_subpix_kernel(%arg0: i32, %arg1: i32, %arg2: i32, %arg3: memref<1x6x4x192xbf16, #tpu.memory_space<vmem>>, %arg4: memref<1x3x192x128xbf16, #tpu.memory_space<vmem>>, %arg5: memref<4x1x4x128xbf16, #tpu.memory_space<vmem>>) attributes {dimension_semantics = [#tpu.dimension_semantics<parallel>, #tpu.dimension_semantics<parallel>, #tpu.dimension_semantics<parallel>], iteration_bounds = array<i64: 2, 4, 1>, scalar_prefetch = 0 : i64, scratch_operands = 0 : i64, tpu.core_type = #tpu.core_type<tc>, window_params = [{transform_indices = @transform_0, window_bounds = array<i64: 1, 6, 4, 192>}, {transform_indices = @transform_1, window_bounds = array<i64: 1, 3, 192, 128>}, {transform_indices = @transform_2, window_bounds = array<i64: 4, 1, 4, 128>}]} {
    %c4_i32 = arith.constant 4 : i32
    %0 = arith.muli %arg2, %c4_i32 : i32
    %cst = arith.constant 0.000000e+00 : f32
    %1 = vector.broadcast %cst : f32 to vector<16x128xf32>
    %c0_i32 = arith.constant 0 : i32
    %2 = arith.addi %0, %c0_i32 : i32
    %c0 = arith.constant 0 : index
    %3 = arith.index_cast %2 : i32 to index
    %c0_0 = arith.constant 0 : index
    %c0_1 = arith.constant 0 : index
    %4 = vector.load %arg3[%c0, %3, %c0_0, %c0_1] : memref<1x6x4x192xbf16, #tpu.memory_space<vmem>>, vector<1x4x4x192xbf16>
    %5 = vector.shape_cast %4 : vector<1x4x4x192xbf16> to vector<4x4x192xbf16>
    %6 = vector.shape_cast %5 : vector<4x4x192xbf16> to vector<16x192xbf16>
    %c0_2 = arith.constant 0 : index
    %c0_3 = arith.constant 0 : index
    %c0_4 = arith.constant 0 : index
    %c0_5 = arith.constant 0 : index
    %7 = vector.load %arg4[%c0_2, %c0_3, %c0_4, %c0_5] : memref<1x3x192x128xbf16, #tpu.memory_space<vmem>>, vector<1x1x192x128xbf16>
    %8 = vector.shape_cast %7 : vector<1x1x192x128xbf16> to vector<192x128xbf16>
    %cst_6 = arith.constant dense<0.000000e+00> : vector<16x128xf32>
    %9 = tpu.matmul %6, %8, %cst_6 {dimension_numbers = #tpu.dot_dimension_numbers<[1], [0], [0], [1], [0, 0, 1, 1], [], []>} : vector<16x192xbf16>, vector<192x128xbf16>, vector<16x128xf32> -> vector<16x128xf32>
    %10 = arith.addf %1, %9 : vector<16x128xf32>
    %c1_i32 = arith.constant 1 : i32
    %11 = arith.addi %0, %c1_i32 : i32
    %c0_7 = arith.constant 0 : index
    %12 = arith.index_cast %11 : i32 to index
    %c0_8 = arith.constant 0 : index
    %c0_9 = arith.constant 0 : index
    %13 = vector.load %arg3[%c0_7, %12, %c0_8, %c0_9] : memref<1x6x4x192xbf16, #tpu.memory_space<vmem>>, vector<1x4x4x192xbf16>
    %14 = vector.shape_cast %13 : vector<1x4x4x192xbf16> to vector<4x4x192xbf16>
    %15 = vector.shape_cast %14 : vector<4x4x192xbf16> to vector<16x192xbf16>
    %c0_10 = arith.constant 0 : index
    %c1 = arith.constant 1 : index
    %c0_11 = arith.constant 0 : index
    %c0_12 = arith.constant 0 : index
    %16 = vector.load %arg4[%c0_10, %c1, %c0_11, %c0_12] : memref<1x3x192x128xbf16, #tpu.memory_space<vmem>>, vector<1x1x192x128xbf16>
    %17 = vector.shape_cast %16 : vector<1x1x192x128xbf16> to vector<192x128xbf16>
    %cst_13 = arith.constant dense<0.000000e+00> : vector<16x128xf32>
    %18 = tpu.matmul %15, %17, %cst_13 {dimension_numbers = #tpu.dot_dimension_numbers<[1], [0], [0], [1], [0, 0, 1, 1], [], []>} : vector<16x192xbf16>, vector<192x128xbf16>, vector<16x128xf32> -> vector<16x128xf32>
    %19 = arith.addf %10, %18 : vector<16x128xf32>
    %c2_i32 = arith.constant 2 : i32
    %20 = arith.addi %0, %c2_i32 : i32
    %c0_14 = arith.constant 0 : index
    %21 = arith.index_cast %20 : i32 to index
    %c0_15 = arith.constant 0 : index
    %c0_16 = arith.constant 0 : index
    %22 = vector.load %arg3[%c0_14, %21, %c0_15, %c0_16] : memref<1x6x4x192xbf16, #tpu.memory_space<vmem>>, vector<1x4x4x192xbf16>
    %23 = vector.shape_cast %22 : vector<1x4x4x192xbf16> to vector<4x4x192xbf16>
    %24 = vector.shape_cast %23 : vector<4x4x192xbf16> to vector<16x192xbf16>
    %c0_17 = arith.constant 0 : index
    %c2 = arith.constant 2 : index
    %c0_18 = arith.constant 0 : index
    %c0_19 = arith.constant 0 : index
    %25 = vector.load %arg4[%c0_17, %c2, %c0_18, %c0_19] : memref<1x3x192x128xbf16, #tpu.memory_space<vmem>>, vector<1x1x192x128xbf16>
    %26 = vector.shape_cast %25 : vector<1x1x192x128xbf16> to vector<192x128xbf16>
    %cst_20 = arith.constant dense<0.000000e+00> : vector<16x128xf32>
    %27 = tpu.matmul %24, %26, %cst_20 {dimension_numbers = #tpu.dot_dimension_numbers<[1], [0], [0], [1], [0, 0, 1, 1], [], []>} : vector<16x192xbf16>, vector<192x128xbf16>, vector<16x128xf32> -> vector<16x128xf32>
    %28 = arith.addf %19, %27 : vector<16x128xf32>
    %29 = vector.shape_cast %28 : vector<16x128xf32> to vector<4x1x4x128xf32>
    %30 = arith.truncf %29 : vector<4x1x4x128xf32> to vector<4x1x4x128xbf16>
    %c0_21 = arith.constant 0 : index
    %c0_22 = arith.constant 0 : index
    %c0_23 = arith.constant 0 : index
    %c0_24 = arith.constant 0 : index
    %31 = vector.load %arg5[%c0_21, %c0_22, %c0_23, %c0_24] : memref<4x1x4x128xbf16, #tpu.memory_space<vmem>>, vector<4x1x4x128xbf16>
    tpu.vector_store %arg5[%c0_21, %c0_22, %c0_23, %c0_24], %30 {strides = array<i32>} : memref<4x1x4x128xbf16, #tpu.memory_space<vmem>>, vector<4x1x4x128xbf16>,
    return
  }
  func.func @transform_0(%arg0: i32, %arg1: i32, %arg2: i32) -> (i32, i32, i32, i32) {
    %c0_i32 = arith.constant 0 : i32
    %c0_i32_0 = arith.constant 0 : i32
    %c0_i32_1 = arith.constant 0 : i32
    %c0_i32_2 = arith.constant 0 : i32
    return %arg0, %c0_i32, %c0_i32_0, %c0_i32_1 : i32, i32, i32, i32
  }
  func.func @transform_1(%arg0: i32, %arg1: i32, %arg2: i32) -> (i32, i32, i32, i32) {
    %c0_i32 = arith.constant 0 : i32
    %c0_i32_0 = arith.constant 0 : i32
    %c0_i32_1 = arith.constant 0 : i32
    %c0_i32_2 = arith.constant 0 : i32
    return %arg1, %c0_i32, %c0_i32_0, %c0_i32_1 : i32, i32, i32, i32
  }
  func.func @transform_2(%arg0: i32, %arg1: i32, %arg2: i32) -> (i32, i32, i32, i32) {
    %c1_i32 = arith.constant 1 : i32
    %0 = arith.muli %arg0, %c1_i32 : i32
    %1 = arith.addi %0, %arg2 : i32
    %c0_i32 = arith.constant 0 : i32
    %c0_i32_0 = arith.constant 0 : i32
    %c0_i32_1 = arith.constant 0 : i32
    return %1, %arg1, %c0_i32, %c0_i32_0 : i32, i32, i32, i32
  }
}

module attributes {stable_mosaic.version = 11 : i64} {
  func.func @_subpix_kernel(%arg0: i32, %arg1: i32, %arg2: i32, %arg3: memref<1x4x2x384xbf16, #tpu.memory_space<vmem>>, %arg4: memref<1x3x384x256xbf16, #tpu.memory_space<vmem>>, %arg5: memref<2x1x2x256xbf16, #tpu.memory_space<vmem>>) attributes {dimension_semantics = [#tpu.dimension_semantics<parallel>, #tpu.dimension_semantics<parallel>, #tpu.dimension_semantics<parallel>], iteration_bounds = array<i64: 2, 8, 1>, scalar_prefetch = 0 : i64, scratch_operands = 0 : i64, tpu.core_type = #tpu.core_type<tc>, window_params = [{transform_indices = @transform_0, window_bounds = array<i64: 1, 4, 2, 384>}, {transform_indices = @transform_1, window_bounds = array<i64: 1, 3, 384, 256>}, {transform_indices = @transform_2, window_bounds = array<i64: 2, 1, 2, 256>}]} {
    %c2_i32 = arith.constant 2 : i32
    %0 = arith.muli %arg2, %c2_i32 : i32
    %cst = arith.constant 0.000000e+00 : f32
    %1 = vector.broadcast %cst : f32 to vector<4x256xf32>
    %c0_i32 = arith.constant 0 : i32
    %2 = arith.addi %0, %c0_i32 : i32
    %c0 = arith.constant 0 : index
    %3 = arith.index_cast %2 : i32 to index
    %c0_0 = arith.constant 0 : index
    %c0_1 = arith.constant 0 : index
    %4 = vector.load %arg3[%c0, %3, %c0_0, %c0_1] : memref<1x4x2x384xbf16, #tpu.memory_space<vmem>>, vector<1x2x2x384xbf16>
    %5 = vector.shape_cast %4 : vector<1x2x2x384xbf16> to vector<2x2x384xbf16>
    %6 = vector.shape_cast %5 : vector<2x2x384xbf16> to vector<4x384xbf16>
    %c0_2 = arith.constant 0 : index
    %c0_3 = arith.constant 0 : index
    %c0_4 = arith.constant 0 : index
    %c0_5 = arith.constant 0 : index
    %7 = vector.load %arg4[%c0_2, %c0_3, %c0_4, %c0_5] : memref<1x3x384x256xbf16, #tpu.memory_space<vmem>>, vector<1x1x384x256xbf16>
    %8 = vector.shape_cast %7 : vector<1x1x384x256xbf16> to vector<384x256xbf16>
    %cst_6 = arith.constant dense<0.000000e+00> : vector<4x256xf32>
    %9 = tpu.matmul %6, %8, %cst_6 {dimension_numbers = #tpu.dot_dimension_numbers<[1], [0], [0], [1], [0, 0, 1, 1], [], []>} : vector<4x384xbf16>, vector<384x256xbf16>, vector<4x256xf32> -> vector<4x256xf32>
    %10 = arith.addf %1, %9 : vector<4x256xf32>
    %c1_i32 = arith.constant 1 : i32
    %11 = arith.addi %0, %c1_i32 : i32
    %c0_7 = arith.constant 0 : index
    %12 = arith.index_cast %11 : i32 to index
    %c0_8 = arith.constant 0 : index
    %c0_9 = arith.constant 0 : index
    %13 = vector.load %arg3[%c0_7, %12, %c0_8, %c0_9] : memref<1x4x2x384xbf16, #tpu.memory_space<vmem>>, vector<1x2x2x384xbf16>
    %14 = vector.shape_cast %13 : vector<1x2x2x384xbf16> to vector<2x2x384xbf16>
    %15 = vector.shape_cast %14 : vector<2x2x384xbf16> to vector<4x384xbf16>
    %c0_10 = arith.constant 0 : index
    %c1 = arith.constant 1 : index
    %c0_11 = arith.constant 0 : index
    %c0_12 = arith.constant 0 : index
    %16 = vector.load %arg4[%c0_10, %c1, %c0_11, %c0_12] : memref<1x3x384x256xbf16, #tpu.memory_space<vmem>>, vector<1x1x384x256xbf16>
    %17 = vector.shape_cast %16 : vector<1x1x384x256xbf16> to vector<384x256xbf16>
    %cst_13 = arith.constant dense<0.000000e+00> : vector<4x256xf32>
    %18 = tpu.matmul %15, %17, %cst_13 {dimension_numbers = #tpu.dot_dimension_numbers<[1], [0], [0], [1], [0, 0, 1, 1], [], []>} : vector<4x384xbf16>, vector<384x256xbf16>, vector<4x256xf32> -> vector<4x256xf32>
    %19 = arith.addf %10, %18 : vector<4x256xf32>
    %c2_i32_14 = arith.constant 2 : i32
    %20 = arith.addi %0, %c2_i32_14 : i32
    %c0_15 = arith.constant 0 : index
    %21 = arith.index_cast %20 : i32 to index
    %c0_16 = arith.constant 0 : index
    %c0_17 = arith.constant 0 : index
    %22 = vector.load %arg3[%c0_15, %21, %c0_16, %c0_17] : memref<1x4x2x384xbf16, #tpu.memory_space<vmem>>, vector<1x2x2x384xbf16>
    %23 = vector.shape_cast %22 : vector<1x2x2x384xbf16> to vector<2x2x384xbf16>
    %24 = vector.shape_cast %23 : vector<2x2x384xbf16> to vector<4x384xbf16>
    %c0_18 = arith.constant 0 : index
    %c2 = arith.constant 2 : index
    %c0_19 = arith.constant 0 : index
    %c0_20 = arith.constant 0 : index
    %25 = vector.load %arg4[%c0_18, %c2, %c0_19, %c0_20] : memref<1x3x384x256xbf16, #tpu.memory_space<vmem>>, vector<1x1x384x256xbf16>
    %26 = vector.shape_cast %25 : vector<1x1x384x256xbf16> to vector<384x256xbf16>
    %cst_21 = arith.constant dense<0.000000e+00> : vector<4x256xf32>
    %27 = tpu.matmul %24, %26, %cst_21 {dimension_numbers = #tpu.dot_dimension_numbers<[1], [0], [0], [1], [0, 0, 1, 1], [], []>} : vector<4x384xbf16>, vector<384x256xbf16>, vector<4x256xf32> -> vector<4x256xf32>
    %28 = arith.addf %19, %27 : vector<4x256xf32>
    %29 = vector.shape_cast %28 : vector<4x256xf32> to vector<2x1x2x256xf32>
    %30 = arith.truncf %29 : vector<2x1x2x256xf32> to vector<2x1x2x256xbf16>
    %c0_22 = arith.constant 0 : index
    %c0_23 = arith.constant 0 : index
    %c0_24 = arith.constant 0 : index
    %c0_25 = arith.constant 0 : index
    %31 = vector.load %arg5[%c0_22, %c0_23, %c0_24, %c0_25] : memref<2x1x2x256xbf16, #tpu.memory_space<vmem>>, vector<2x1x2x256xbf16>
    tpu.vector_store %arg5[%c0_22, %c0_23, %c0_24, %c0_25], %30 {strides = array<i32>} : memref<2x1x2x256xbf16, #tpu.memory_space<vmem>>, vector<2x1x2x256xbf16>,
    return
  }
  func.func @transform_0(%arg0: i32, %arg1: i32, %arg2: i32) -> (i32, i32, i32, i32) {
    %c0_i32 = arith.constant 0 : i32
    %c0_i32_0 = arith.constant 0 : i32
    %c0_i32_1 = arith.constant 0 : i32
    %c0_i32_2 = arith.constant 0 : i32
    return %arg0, %c0_i32, %c0_i32_0, %c0_i32_1 : i32, i32, i32, i32
  }
  func.func @transform_1(%arg0: i32, %arg1: i32, %arg2: i32) -> (i32, i32, i32, i32) {
    %c0_i32 = arith.constant 0 : i32
    %c0_i32_0 = arith.constant 0 : i32
    %c0_i32_1 = arith.constant 0 : i32
    %c0_i32_2 = arith.constant 0 : i32
    return %arg1, %c0_i32, %c0_i32_0, %c0_i32_1 : i32, i32, i32, i32
  }
  func.func @transform_2(%arg0: i32, %arg1: i32, %arg2: i32) -> (i32, i32, i32, i32) {
    %c1_i32 = arith.constant 1 : i32
    %0 = arith.muli %arg0, %c1_i32 : i32
    %1 = arith.addi %0, %arg2 : i32
    %c0_i32 = arith.constant 0 : i32
    %c0_i32_0 = arith.constant 0 : i32
    %c0_i32_1 = arith.constant 0 : i32
    return %1, %arg1, %c0_i32, %c0_i32_0 : i32, i32, i32, i32
  }
}

module attributes {stable_mosaic.version = 11 : i64} {
  func.func @_bn_stats_kernel(%arg0: i32, %arg1: i32, %arg2: i32, %arg3: memref<1x16x512xbf16, #tpu.memory_space<vmem>>, %arg4: memref<1x16x512xbf16, #tpu.memory_space<vmem>>, %arg5: memref<1x16x512xbf16, #tpu.memory_space<vmem>>, %arg6: memref<1x16x512xbf16, #tpu.memory_space<vmem>>, %arg7: memref<1x1x2x512xf32, #tpu.memory_space<vmem>>) attributes {dimension_semantics = [#tpu.dimension_semantics<parallel>, #tpu.dimension_semantics<parallel>, #tpu.dimension_semantics<parallel>], iteration_bounds = array<i64: 2, 1, 1>, scalar_prefetch = 0 : i64, scratch_operands = 0 : i64, tpu.core_type = #tpu.core_type<tc>, window_params = [{transform_indices = @transform_0, window_bounds = array<i64: 1, 16, 512>}, {transform_indices = @transform_1, window_bounds = array<i64: 1, 16, 512>}, {transform_indices = @transform_2, window_bounds = array<i64: 1, 16, 512>}, {transform_indices = @transform_3, window_bounds = array<i64: 1, 16, 512>}, {transform_indices = @transform_4, window_bounds = array<i64: 1, 1, 2, 512>}]} {
    %c0 = arith.constant 0 : index
    %c0_0 = arith.constant 0 : index
    %c0_1 = arith.constant 0 : index
    %0 = vector.load %arg3[%c0, %c0_0, %c0_1] : memref<1x16x512xbf16, #tpu.memory_space<vmem>>, vector<1x16x512xbf16>
    %1 = vector.shape_cast %0 : vector<1x16x512xbf16> to vector<16x512xbf16>
    %2 = arith.extf %1 : vector<16x512xbf16> to vector<16x512xf32>
    %c0_2 = arith.constant 0 : index
    %c0_3 = arith.constant 0 : index
    %c0_4 = arith.constant 0 : index
    %3 = vector.load %arg4[%c0_2, %c0_3, %c0_4] : memref<1x16x512xbf16, #tpu.memory_space<vmem>>, vector<1x16x512xbf16>
    %4 = vector.shape_cast %3 : vector<1x16x512xbf16> to vector<16x512xbf16>
    %5 = arith.extf %4 : vector<16x512xbf16> to vector<16x512xf32>
    %6 = arith.addf %2, %5 : vector<16x512xf32>
    %c0_5 = arith.constant 0 : index
    %c0_6 = arith.constant 0 : index
    %c0_7 = arith.constant 0 : index
    %7 = vector.load %arg5[%c0_5, %c0_6, %c0_7] : memref<1x16x512xbf16, #tpu.memory_space<vmem>>, vector<1x16x512xbf16>
    %8 = vector.shape_cast %7 : vector<1x16x512xbf16> to vector<16x512xbf16>
    %9 = arith.extf %8 : vector<16x512xbf16> to vector<16x512xf32>
    %10 = arith.addf %6, %9 : vector<16x512xf32>
    %11 = arith.truncf %10 : vector<16x512xf32> to vector<16x512xbf16>
    %c0_8 = arith.constant 0 : index
    %c0_9 = arith.constant 0 : index
    %c0_10 = arith.constant 0 : index
    %12 = vector.load %arg6[%c0_8, %c0_9, %c0_10] : memref<1x16x512xbf16, #tpu.memory_space<vmem>>, vector<1x16x512xbf16>
    %13 = vector.shape_cast %12 : vector<1x16x512xbf16> to vector<16x512xbf16>
    %14 = vector.shape_cast %11 : vector<16x512xbf16> to vector<1x16x512xbf16>
    tpu.vector_store %arg6[%c0_8, %c0_9, %c0_10], %14 {strides = array<i32>} : memref<1x16x512xbf16, #tpu.memory_space<vmem>>, vector<1x16x512xbf16>,
    %cst = arith.constant dense<0.000000e+00> : vector<512xf32>
    %15 = vector.multi_reduction <add>, %10, %cst [0] : vector<16x512xf32> to vector<512xf32>
    %c0_11 = arith.constant 0 : index
    %c0_12 = arith.constant 0 : index
    %c0_13 = arith.constant 0 : index
    %c0_14 = arith.constant 0 : index
    %16 = vector.load %arg7[%c0_11, %c0_12, %c0_13, %c0_14] : memref<1x1x2x512xf32, #tpu.memory_space<vmem>>, vector<1x1x1x512xf32>
    %17 = vector.shape_cast %16 : vector<1x1x1x512xf32> to vector<512xf32>
    %18 = vector.shape_cast %15 : vector<512xf32> to vector<1x1x1x512xf32>
    tpu.vector_store %arg7[%c0_11, %c0_12, %c0_13, %c0_14], %18 {strides = array<i32>} : memref<1x1x2x512xf32, #tpu.memory_space<vmem>>, vector<1x1x1x512xf32>,
    %19 = arith.mulf %10, %10 : vector<16x512xf32>
    %cst_15 = arith.constant dense<0.000000e+00> : vector<512xf32>
    %20 = vector.multi_reduction <add>, %19, %cst_15 [0] : vector<16x512xf32> to vector<512xf32>
    %c0_16 = arith.constant 0 : index
    %c0_17 = arith.constant 0 : index
    %c1 = arith.constant 1 : index
    %c0_18 = arith.constant 0 : index
    %21 = vector.load %arg7[%c0_16, %c0_17, %c1, %c0_18] : memref<1x1x2x512xf32, #tpu.memory_space<vmem>>, vector<1x1x1x512xf32>
    %22 = vector.shape_cast %21 : vector<1x1x1x512xf32> to vector<512xf32>
    %23 = vector.shape_cast %20 : vector<512xf32> to vector<1x1x1x512xf32>
    tpu.vector_store %arg7[%c0_16, %c0_17, %c1, %c0_18], %23 {strides = array<i32>} : memref<1x1x2x512xf32, #tpu.memory_space<vmem>>, vector<1x1x1x512xf32>,
    return
  }
  func.func @transform_0(%arg0: i32, %arg1: i32, %arg2: i32) -> (i32, i32, i32) {
    %c0_i32 = arith.constant 0 : i32
    return %arg0, %arg1, %arg2 : i32, i32, i32
  }
  func.func @transform_1(%arg0: i32, %arg1: i32, %arg2: i32) -> (i32, i32, i32) {
    %c0_i32 = arith.constant 0 : i32
    return %arg0, %arg1, %arg2 : i32, i32, i32
  }
  func.func @transform_2(%arg0: i32, %arg1: i32, %arg2: i32) -> (i32, i32, i32) {
    %c0_i32 = arith.constant 0 : i32
    return %arg0, %arg1, %arg2 : i32, i32, i32
  }
  func.func @transform_3(%arg0: i32, %arg1: i32, %arg2: i32) -> (i32, i32, i32) {
    %c0_i32 = arith.constant 0 : i32
    return %arg0, %arg1, %arg2 : i32, i32, i32
  }
  func.func @transform_4(%arg0: i32, %arg1: i32, %arg2: i32) -> (i32, i32, i32, i32) {
    %c0_i32 = arith.constant 0 : i32
    %c0_i32_0 = arith.constant 0 : i32
    return %arg0, %arg1, %c0_i32, %arg2 : i32, i32, i32, i32
  }
}

module attributes {stable_mosaic.version = 11 : i64} {
  func.func @_bn_apply_kernel(%arg0: i32, %arg1: i32, %arg2: i32, %arg3: memref<1x16x512xbf16, #tpu.memory_space<vmem>>, %arg4: memref<1x512xf32, #tpu.memory_space<vmem>>, %arg5: memref<1x512xf32, #tpu.memory_space<vmem>>, %arg6: memref<1x16x512xf32, #tpu.memory_space<vmem>>) attributes {dimension_semantics = [#tpu.dimension_semantics<parallel>, #tpu.dimension_semantics<parallel>, #tpu.dimension_semantics<parallel>], iteration_bounds = array<i64: 2, 1, 1>, scalar_prefetch = 0 : i64, scratch_operands = 0 : i64, tpu.core_type = #tpu.core_type<tc>, window_params = [{transform_indices = @transform_0, window_bounds = array<i64: 1, 16, 512>}, {transform_indices = @transform_1, window_bounds = array<i64: 1, 512>}, {transform_indices = @transform_2, window_bounds = array<i64: 1, 512>}, {transform_indices = @transform_3, window_bounds = array<i64: 1, 16, 512>}]} {
    %c0 = arith.constant 0 : index
    %c0_0 = arith.constant 0 : index
    %c0_1 = arith.constant 0 : index
    %0 = vector.load %arg3[%c0, %c0_0, %c0_1] : memref<1x16x512xbf16, #tpu.memory_space<vmem>>, vector<1x16x512xbf16>
    %1 = arith.extf %0 : vector<1x16x512xbf16> to vector<1x16x512xf32>
    %c0_2 = arith.constant 0 : index
    %c0_3 = arith.constant 0 : index
    %2 = vector.load %arg4[%c0_2, %c0_3] : memref<1x512xf32, #tpu.memory_space<vmem>>, vector<1x512xf32>
    %3 = vector.shape_cast %2 : vector<1x512xf32> to vector<1x1x512xf32>
    %4 = vector.broadcast %3 : vector<1x1x512xf32> to vector<1x16x512xf32>
    %5 = arith.mulf %1, %4 : vector<1x16x512xf32>
    %c0_4 = arith.constant 0 : index
    %c0_5 = arith.constant 0 : index
    %6 = vector.load %arg5[%c0_4, %c0_5] : memref<1x512xf32, #tpu.memory_space<vmem>>, vector<1x512xf32>
    %7 = vector.shape_cast %6 : vector<1x512xf32> to vector<1x1x512xf32>
    %8 = vector.broadcast %7 : vector<1x1x512xf32> to vector<1x16x512xf32>
    %9 = arith.addf %5, %8 : vector<1x16x512xf32>
    %cst = arith.constant 0.000000e+00 : f32
    %10 = vector.broadcast %cst : f32 to vector<1x16x512xf32>
    %11 = arith.maximumf %9, %10 : vector<1x16x512xf32>
    %c0_6 = arith.constant 0 : index
    %c0_7 = arith.constant 0 : index
    %c0_8 = arith.constant 0 : index
    %12 = vector.load %arg6[%c0_6, %c0_7, %c0_8] : memref<1x16x512xf32, #tpu.memory_space<vmem>>, vector<1x16x512xf32>
    tpu.vector_store %arg6[%c0_6, %c0_7, %c0_8], %11 {strides = array<i32>} : memref<1x16x512xf32, #tpu.memory_space<vmem>>, vector<1x16x512xf32>,
    return
  }
  func.func @transform_0(%arg0: i32, %arg1: i32, %arg2: i32) -> (i32, i32, i32) {
    %c0_i32 = arith.constant 0 : i32
    return %arg0, %arg1, %arg2 : i32, i32, i32
  }
  func.func @transform_1(%arg0: i32, %arg1: i32, %arg2: i32) -> (i32, i32) {
    %c0_i32 = arith.constant 0 : i32
    %c0_i32_0 = arith.constant 0 : i32
    return %c0_i32, %arg2 : i32, i32
  }
  func.func @transform_2(%arg0: i32, %arg1: i32, %arg2: i32) -> (i32, i32) {
    %c0_i32 = arith.constant 0 : i32
    %c0_i32_0 = arith.constant 0 : i32
    return %c0_i32, %arg2 : i32, i32
  }
  func.func @transform_3(%arg0: i32, %arg1: i32, %arg2: i32) -> (i32, i32, i32) {
    %c0_i32 = arith.constant 0 : i32
    return %arg0, %arg1, %arg2 : i32, i32, i32
  }
}

</mosaic_0001>

<bundles_post_ra>
// kernel: image_decoder_forward.6
= control target key start
LH: loop header
LB: loop body
LE: loop exit
PB: predicated region body
PF: predicated region fallthrough
CT: control target
= control target key end

     0   :  { %7 = vsyncpa [#allocation3], 0  ;;  %s1576_s0 = inlined_call_operand.vmem [shape: bf16[2,6,4,192], index: 0, kind: input, shape index: {}]   ;;  %s1577_s1 = inlined_call_operand.hbm [shape: bf16[4,3,192,128], index: 1, kind: input, shape index: {}]   ;;  %s1578_s2 = inlined_call_operand.vmem [shape: bf16[8,4,4,128], index: 2, kind: output, shape index: {}]  }
   0x1   :  { %9 = vsyncpa [#allocation3 + $0x1], 0  ;;  %s1293_s9 = smov 0   ;;  %s1295_s10 = smov 0  }
   0x2   :  { %s1297_s11 = smov 0   ;;  %s1299_s12 = smov 0  }
   0x3   :  { %s1301_s13 = smov 0   ;;  %s1303_s14 = smov 0  }
   0x4   :  { %s1305_s15 = smov 0   ;;  %s1307_s16 = smov 0  }
   0x5   :  { %s1309_s17 = smov 0   ;;  %s1311_s18 = smov 0  }
   0x6 LB: > { %s901_s19 = sadd.s32 4294967295, %s1272_s18   ;;  %s30_s20 = sadd.s32 1, %s1264_s16  ;;  %s1272_s18 = sphi %s1311_s18, %s15_s18   ;;  %s1268_s17 = sphi %s1309_s17, %s1593_s17   ;;  %s1264_s16 = sphi %s1307_s16, %s1592_s16   ;;  %s1260_s15 = sphi %s1305_s15, %s1591_s15   ;;  %s1256_s14 = sphi %s1303_s14, %s1590_s14   ;;  %s1252_s13 = sphi %s1301_s13, %s1589_s13   ;;  %s1248_s12 = sphi %s1299_s12, %s1588_s12   ;;  %s1244_s11 = sphi %s1297_s11, %s1587_s11   ;;  %s1240_s10 = sphi %s1295_s10, %s1586_s10   ;;  %s1236_s9 = sphi %s1293_s9, %s1585_s9  }
   0x7   : > { %p32_p0 = scmp.ge.s32.totalorder %s30_s20, 4  ;;  %s34_s21 = sadd.s32 1, %s1268_s17 }
   0x8   : > { %s67_s22 = sadd.s32 1, %s1252_s13  ;;  %p74_p1 = scmp.ne.s32.totalorder %s1252_s13, %s1248_s12 }
   0x9   : > { %s1595_s20 = smov (%p32_p0, %s30_s20), 0  ;;  %s1597_s21 = smov (!%p32_p0, %s34_s21), %s1268_s17 }
   0xa   : > { %s64_s23 = ssub.s32 %s1264_s16, %s1595_s20  ;;  %p75_p2 = scmp.eq.s32.totalorder %s1272_s18, 0 }
   0xb   : > { %p36_p3 = scmp.ge.s32.totalorder %s1597_s21, 2  ;;  %p65_p4 = scmp.eq.s32.totalorder %s64_s23, 0 }
   0xc   : > { %p1353_p5 = por %p75_p2, %p74_p1  ;;  %p80_p6 = scmp.ne.s32.totalorder %s1248_s12, %s1244_s11 }
   0xd   : > { %s1599_s21 = smov (%p36_p3, %s1597_s21), 0  ;;  %p81_p7 = scmp.eq.s32.totalorder %s901_s19, 0 }
   0xe   : > { %s1361_s25 = scalar_select %p65_p4, %s1252_s13, %s67_s22  }
   0xf   : > { %s92_s26 = ssub.s32 %s1268_s17, %s1599_s21  ;;  %s97_s28 = sadd.s32 1, %s1240_s10 }
  0x10   : > { %s94_s27 = sor.u32 %s92_s26, %s64_s23  ;;  %p1366_p8 = por %p81_p7, %p80_p6 }
  0x11   : > { %p95_p9 = scmp.eq.s32.totalorder %s94_s27, 0  ;;  %p107_p10 = scmp.ne.s32.totalorder %s1240_s10, %s1236_s9 }
  0x12   : > { %p108_p11 = scmp.eq.s32.totalorder %s901_s19, 7  ;;  %p1027_p13 = scmp.lt.s32.totalorder %s1272_s18, 8 }
  0x13   : > { %s1373_s30 = scalar_select %p95_p9, %s1240_s10, %s97_s28  }
  0x14   : > { %p1375_p12 = por %p108_p11, %p107_p10  ;;  %s142_s4 = sand.u32 1, %s1252_s13  }
  0x15   : > { %s1017_s5 = smul.u32 288, %s142_s4  ;;  %p1384_p0 = pnand %p1027_p13, %p1353_p5 }
  0x16   : > { %s1581_s3 = scalar_select %p1375_p12, 1, 0 }
  0x17   : > { %s1018_s6 = smul.u32 4608, %s1264_s16  ;;  %s146_s22 = scalar_lea.vmem [#allocation2], %s1017_s5 }
  0x18   : > { %s153_s23 = sshll.u32 %s146_s22, 4  ;;  %s1396_s24 = scalar_lea.sflag [#allocation3], %s142_s4  ;;  %s1393_s23 = int_to_ptr.vmem [resolvable:$true] %s153_s23 }
  0x19   : > { %s1391_s19 = scalar_lea.hbm %s1577_s1, %s1018_s6  ;;  %p1162_p3 = pneg %p1384_p0 }
  0x1a   : > { %s1160_s26 = scalar_lea.hbm %s1391_s19, 4608  ;;  %s1165_s6 = scalar_lea.hbm %s1577_s1, 18432 }
  0x1b   : > { %p1161_p2 = scmp.ne.s32.totalorder %s1391_s19, %s1160_s26  ;;  %p1166_p6 = scmp.lt.u32.totalorder %s1391_s19, %s1577_s1 }
  0x1c   : > { %p1167_p7 = scmp.lt.u32.totalorder %s1165_s6, %s1160_s26  ;;  %p1169_p10 = scmp.lt.u32.totalorder %s1160_s26, %s1391_s19 }
  0x1d   : > { %p1163_p4 = pnand %p1162_p3, %p1161_p2 }
  0x1e   : > { %p1168_p9 = por %p1167_p7, %p1166_p6 }
  0x1f   : > { %p1164_p5 = pneg %p1163_p4 }
  0x20   : > { %p1170_p11 = por %p1169_p10, %p1168_p9 }
  0x22   : > { %p1171_p13 = pnand %p1170_p11, %p1164_p5 }
  0x24   : > { %1174 = shalt.err (!%p1171_p13)
}
  0x25   : > { %s1175_s4 = scalar_lea.vmem %s1393_s23, 4608  ;;  %s1274_s11 = smov [#allocation2]  }
  0x26   : > { %p1176_p2 = scmp.ne.s32.totalorder %s1393_s23, %s1175_s4  ;;  %s1180_s22 = sshll.u32 %s1274_s11, 4  ;;  %s1181_s22 = int_to_ptr.vmem [resolvable:$false] %s1180_s22 }
  0x27   : > { %s1182_s27 = scalar_lea.vmem %s1181_s22, 9216  ;;  %p1183_p12 = scmp.lt.s32.totalorder %s1393_s23, %s1181_s22 }
  0x28   : > { %p1178_p4 = pnand %p1176_p2, %p1162_p3  ;;  %p1184_p6 = scmp.lt.s32.totalorder %s1182_s27, %s1175_s4 }
  0x2a   : > { %p1179_p1 = pneg %p1178_p4  ;;  %p1185_p7 = por %p1184_p6, %p1183_p12 }
  0x2c   : > { %p1186_p9 = pnand %p1185_p7, %p1179_p1 }
  0x2e   : > { %1189 = shalt.err (!%p1186_p9)
}
  0x2f   : > { %s1275_s26 = smov 64   ;;  %s1276_s28 = smov 4  }
  0x30   : > { %1026 = dma.hbm_to_vmem [thread:$0]  (!%p1384_p0), %s1391_s19, 4608, %s1393_s23, %s1396_s24, %s1275_s26, %s1275_s26, %s1276_s28  }
  0x31   : > { %p161_p3 = scmp.lt.s32.totalorder %s1272_s18, 9  ;;  %p1583_p5 = scmp.ge.s32.totalorder %s1272_s18, 1 }
  0x33   : > { %p162_p10 = pnand %p1583_p5, %p161_p3 }
  0x34   : > { %s167_s6 = sand.u32 (!%p162_p10), 1, %s1248_s12  }
  0x35   : > { %165 = sbr.rel (%p162_p10) target bundleno = 387 (0x183), region = 28  ;;  %s168_s5 = scalar_lea.sflag (!%p162_p10), [#allocation3], %s167_s6 }
  0x36   : > { %s1019_s8 = smul.u32 (!%p162_p10), 288, %s167_s6 }
  0x38   : > { %s1428_s4 = scalar_lea.vmem (!%p162_p10), [#allocation2], %s1019_s8 }
  0x3c   : > { %1231 = dma.done.wait (%p1366_p8), %s168_s5, 4608  }
  0x3d   : > { %1233 = vsyncadd (%p1366_p8), %s168_s5, 4294962688  ;;  %v1277_v0 = vmov 0   ;;  %p196_p12 = scmp.lt.s32.totalorder %s1260_s15, 1  ;;  %v1112_v1 = vld [vmem:[%s1428_s4] sm:$0xff]   ;;  %v1113_v2 = vld [vmem:[%s1428_s4 + $0x8] sm:$0xff]   ;;  %vm364_vm0 = vcmask 523264  }
  0x3e   : > { %507 = vmatprep.subr.bf16.mxu0 %v1277_v0  ;;  %368 = vmatprep.subr.bf16.mxu1 %v1277_v0  ;;  %v1114_v3 = vld [vmem:[%s1428_s4 + $0x10] sm:$0xff]   ;;  %v1115_v4 = vld [vmem:[%s1428_s4 + $0x18] sm:$0xff]   ;;  %v1116_v5 = vld [vmem:[%s1428_s4 + $0x20] sm:$0xff]   ;;  %s193_s11 = sand.u32 1, %s1236_s9   ;;  %p1584_p8 = scmp.ne.s32.totalorder %s1581_s3, 0 }
  0x3f   : > { %508 = vmatpush1.bf16.msra.mxu0 %v1112_v1  ;;  %s197_s29 = scalar_select %p196_p12, %s1260_s15, 1  ;;  %v1124_v6 = vld [vmem:[%s1428_s4 + $0x60] sm:$0xff]   ;;  %v1128_v9 = vld [vmem:[%s1428_s4 + $0x68] sm:$0xff]   ;;  %v1130_v12 = vld [vmem:[%s1428_s4 + $0x70] sm:$0xff]  }
  0x40   : > { %509 = vmatprep.subr.bf16.mxu0 %v1277_v0  ;;  %369 = vmatpush1.bf16.msra.mxu1 %v1124_v6  ;;  %v1117_v10 = vld [vmem:[%s1428_s4 + $0x28] sm:$0xff]   ;;  %v1118_v13 = vld [vmem:[%s1428_s4 + $0x30] sm:$0xff]   ;;  %v1132_v14 = vld [vmem:[%s1428_s4 + $0x78] sm:$0xff]   ;;  %s907_s22 = sshll.u32 %s193_s11, 3  ;;  %s1010_s9 = sshll.u32 (%p1584_p8), %s1260_s15, 4 }
  0x41   : > { %s1020_s7 = smul.u32 24, %s197_s29  ;;  %370 = vmatprep.subr.bf16.mxu1 %v1277_v0  ;;  %v1119_v15 = vld [vmem:[%s1428_s4 + $0x38] sm:$0xff]   ;;  %v1134_v16 = vld [vmem:[%s1428_s4 + $0x80] sm:$0xff]   ;;  %v1136_v18 = vld [vmem:[%s1428_s4 + $0x88] sm:$0xff]   ;;  %s195_s27 = scalar_lea.vmem [#allocation4], %s907_s22 }
  0x42   : > { %v1120_v17 = vld [vmem:[%s1428_s4 + $0x40] sm:$0xff]   ;;  %v1121_v19 = vld [vmem:[%s1428_s4 + $0x48] sm:$0xff]   ;;  %v1138_v20 = vld [vmem:[%s1428_s4 + $0x90] sm:$0xff]   ;;  %s746_s26 = sadd.s32 (%p1584_p8), %s1256_s14, %s1010_s9 }
  0x43   : > { %510 = vmatpush1.bf16.msra.mxu0 %v1113_v2  ;;  %s1448_s24 = scalar_lea.vmem %s1576_s0, %s1020_s7  ;;  %v1122_v21 = vld [vmem:[%s1428_s4 + $0x50] sm:$0xff]   ;;  %v1140_v22 = vld [vmem:[%s1428_s4 + $0x98] sm:$0xff]   ;;  %v1142_v28 = vld [vmem:[%s1428_s4 + $0xa0] sm:$0xff]   ;;  %s1007_s28 = sshll.u32 (%p1584_p8), %s746_s26, 1 }
  0x44   : > { %511 = vmatprep.subr.bf16.mxu0 %v1277_v0  ;;  %v1453_v7 = vld.sshfl [vmem:[%s1448_s24] sm:$0xff pattern:$0x76325410]  ;;  %v1456_v8 = vld.sshfl [vmem:[%s1448_s24 + $0x8] sm:$0xff pattern:$0x76325410]  ;;  %371 = vmatpush1.bf16.msra.mxu1 %v1128_v9  ;;  %s748_s5 = scalar_lea.vmem (%p1584_p8), %s1578_s2, %s1007_s28 }
  0x45   : > { %v430_v11 = vcombine.high %v1453_v7, %v1456_v8  ;;  %372 = vmatprep.subr.bf16.mxu1 %v1277_v0  ;;  %v1156_v23 = vld.sshfl [vmem:[%s1448_s24 + $0x4] sm:$0xff pattern:$0x76325410]  ;;  %v1157_v24 = vld.sshfl [vmem:[%s1448_s24 + $0xc] sm:$0xff pattern:$0x76325410]  ;;  %v429_v30 = vcombine.low %v1453_v7, %v1456_v8 }
  0x46   : > { %v1491_v25 = vld.sshfl [vmem:[%s1448_s24 + $0x8] sm:$0xff pattern:$0x76325410]  ;;  %v1494_v26 = vld.sshfl [vmem:[%s1448_s24 + $0x10] sm:$0xff pattern:$0x76325410]  ;;  %v290_v29 = vcombine.high %v1156_v23, %v1157_v24  ;;  %v289_v38 = vcombine.low %v1156_v23, %v1157_v24 }
  0x47   : > { %512 = vmatpush1.bf16.msra.mxu0 %v1114_v3  ;;  %962 = vmatprep.mubr.msk.bf16.mxu0 %vm364_vm0, %v430_v11  ;;  %v1123_v27 = vld [vmem:[%s1428_s4 + $0x58] sm:$0xff]   ;;  %v1127_v31 = vld [vmem:[%s1428_s4 + $0xc0] sm:$0xff]   ;;  %v1144_v32 = vld [vmem:[%s1428_s4 + $0xa8] sm:$0xff]   ;;  %v602_v33 = vcombine.high %v1491_v25, %v1494_v26  ;;  %v601_v48 = vcombine.low %v1491_v25, %v1494_v26 }
  0x48   : > { %513 = vmatprep.subr.bf16.mxu0 %v1277_v0  ;;  %373 = vmatpush1.bf16.msra.mxu1 %v1130_v12  ;;  %v1129_v34 = vld [vmem:[%s1428_s4 + $0xc8] sm:$0xff]   ;;  %v1146_v35 = vld [vmem:[%s1428_s4 + $0xb0] sm:$0xff]   ;;  %v1148_v37 = vld [vmem:[%s1428_s4 + $0xb8] sm:$0xff]  }
  0x49   : > { %374 = vmatprep.subr.bf16.mxu1 %v1277_v0  ;;  %949 = vmatprep.mubr.msk.bf16.mxu1 %vm364_vm0, %v290_v29  ;;  %v1131_v36 = vld [vmem:[%s1428_s4 + $0xd0] sm:$0xff]   ;;  %v1133_v39 = vld [vmem:[%s1428_s4 + $0xd8] sm:$0xff]   ;;  %v1135_v40 = vld [vmem:[%s1428_s4 + $0xe0] sm:$0xff]  }
  0x4a   : > { %v1137_v41 = vld [vmem:[%s1428_s4 + $0xe8] sm:$0xff]   ;;  %v1139_v42 = vld [vmem:[%s1428_s4 + $0xf0] sm:$0xff]   ;;  %v1141_v43 = vld [vmem:[%s1428_s4 + $0xf8] sm:$0xff]  }
  0x4b   : > { %514 = vmatpush1.bf16.msra.mxu0 %v1115_v4  ;;  %v1143_v44 = vld [vmem:[%s1428_s4 + $0x100] sm:$0xff]   ;;  %v1145_v45 = vld [vmem:[%s1428_s4 + $0x108] sm:$0xff]   ;;  %v1147_v46 = vld [vmem:[%s1428_s4 + $0x110] sm:$0xff]  }
  0x4c   : > { %515 = vmatprep.subr.bf16.mxu0 %v1277_v0  ;;  %375 = vmatpush1.bf16.msra.mxu1 %v1132_v14  ;;  %v1151_v47 = vld [vmem:[%s1428_s4 + $0x118] sm:$0xff]  }
  0x4d   : > { %376 = vmatprep.subr.bf16.mxu1 %v1277_v0 }
  0x4f   : > { %516 = vmatpush1.bf16.msra.mxu0 %v1116_v5 }
  0x50   : > { %517 = vmatprep.subr.bf16.mxu0 %v1277_v0  ;;  %377 = vmatpush1.bf16.msra.mxu1 %v1134_v16 }
  0x51   : > { %378 = vmatprep.subr.bf16.mxu1 %v1277_v0 }
  0x53   : > { %518 = vmatpush1.bf16.msra.mxu0 %v1117_v10 }
  0x54   : > { %519 = vmatprep.subr.bf16.mxu0 %v1277_v0  ;;  %379 = vmatpush1.bf16.msra.mxu1 %v1136_v18 }
  0x55   : > { %380 = vmatprep.subr.bf16.mxu1 %v1277_v0 }
  0x57   : > { %520 = vmatpush1.bf16.msra.mxu0 %v1118_v13 }
  0x58   : > { %521 = vmatprep.subr.bf16.mxu0 %v1277_v0  ;;  %381 = vmatpush1.bf16.msra.mxu1 %v1138_v20 }
  0x59   : > { %382 = vmatprep.subr.bf16.mxu1 %v1277_v0 }
  0x5b   : > { %522 = vmatpush1.bf16.msra.mxu0 %v1119_v15 }
  0x5c   : > { %523 = vmatprep.subr.bf16.mxu0 %v1277_v0  ;;  %383 = vmatpush1.bf16.msra.mxu1 %v1140_v22 }
  0x5d   : > { %384 = vmatprep.subr.bf16.mxu1 %v1277_v0 }
  0x5f   : > { %524 = vmatpush1.bf16.msra.mxu0 %v1120_v17 }
  0x60   : > { %525 = vmatprep.subr.bf16.mxu0 %v1277_v0  ;;  %385 = vmatpush1.bf16.msra.mxu1 %v1142_v28 }
  0x61   : > { %386 = vmatprep.subr.bf16.mxu1 %v1277_v0 }
  0x63   : > { %526 = vmatpush1.bf16.msra.mxu0 %v1121_v19 }
  0x64   : > { %527 = vmatprep.subr.bf16.mxu0 %v1277_v0  ;;  %387 = vmatpush1.bf16.msra.mxu1 %v1144_v32 }
  0x65   : > { %388 = vmatprep.subr.bf16.mxu1 %v1277_v0 }
  0x67   : > { %528 = vmatpush1.bf16.msra.mxu0 %v1122_v21 }
  0x68   : > { %529 = vmatprep.subr.bf16.mxu0 %v1277_v0  ;;  %389 = vmatpush1.bf16.msra.mxu1 %v1146_v35 }
  0x69   : > { %390 = vmatprep.subr.bf16.mxu1 %v1277_v0 }
  0x6b   : > { %530 = vmatpush1.bf16.msra.mxu0 %v1123_v27 }
  0x6c   : > { %679 = vmatprep.subr.bf16.mxu0 %v1277_v0  ;;  %391 = vmatpush1.bf16.msra.mxu1 %v1148_v37 }
  0x6e   : > { %540 = vmatmul.mubr.bf16.vlgmr.msra.gmra.mrb[0].mxu0 %v429_v30 }
  0x6f   : > { %680 = vmatpush1.bf16.msra.mxu0 %v1127_v31  ;;  %1003 = vmatprep.mubr.msk.bf16.mxu0 %vm364_vm0, %v602_v33 }
  0x70   : > { %681 = vmatprep.subr.bf16.mxu0 %v1277_v0  ;;  %401 = vmatmul.mubr.bf16.vlgmr.msra.gmra.mrb[0].mxu1 %v289_v38 }
  0x73   : > { %682 = vmatpush1.bf16.msra.mxu0 %v1129_v34 }
  0x74   : > { %683 = vmatprep.subr.bf16.mxu0 %v1277_v0 }
  0x77   : > { %684 = vmatpush1.bf16.msra.mxu0 %v1131_v36 }
  0x78   : > { %685 = vmatprep.subr.bf16.mxu0 %v1277_v0 }
  0x7b   : > { %686 = vmatpush1.bf16.msra.mxu0 %v1133_v39 }
  0x7c   : > { %687 = vmatprep.subr.bf16.mxu0 %v1277_v0 }
  0x7f   : > { %688 = vmatpush1.bf16.msra.mxu0 %v1135_v40 }
  0x80   : > { %689 = vmatprep.subr.bf16.mxu0 %v1277_v0 }
  0x83   : > { %690 = vmatpush1.bf16.msra.mxu0 %v1137_v41 }
  0x84   : > { %691 = vmatprep.subr.bf16.mxu0 %v1277_v0 }
  0x87   : > { %692 = vmatpush1.bf16.msra.mxu0 %v1139_v42 }
  0x88   : > { %693 = vmatprep.subr.bf16.mxu0 %v1277_v0 }
  0x8b   : > { %694 = vmatpush1.bf16.msra.mxu0 %v1141_v43 }
  0x8c   : > { %695 = vmatprep.subr.bf16.mxu0 %v1277_v0 }
  0x8f   : > { %696 = vmatpush1.bf16.msra.mxu0 %v1143_v44 }
  0x90   : > { %697 = vmatprep.subr.bf16.mxu0 %v1277_v0 }
  0x93   : > { %698 = vmatpush1.bf16.msra.mxu0 %v1145_v45 }
  0x94   : > { %699 = vmatprep.subr.bf16.mxu0 %v1277_v0 }
  0x97   : > { %700 = vmatpush1.bf16.msra.mxu0 %v1147_v46 }
  0x98   : > { %701 = vmatprep.subr.bf16.mxu0 %v1277_v0 }
  0x9b   : > { %702 = vmatpush1.bf16.msra.mxu0 %v1151_v47 }
  0x9e   : > { %712 = vmatmul.mubr.bf16.vlgmr.msra.gmra.mrb[0].mxu0 %v601_v48 }
 0x143   : > { %v402_v49 = vpop.f32.mrb[0].mxu1 }
 0x144   : > { %v404_v50 = vpop.f32.mrb[1].mxu1 }
 0x145   : > { %v405_v51 = vpop.f32.mrb[2].mxu1 }
 0x146   : > { %v407_v52 = vpop.f32.mrb[3].mxu1 }
 0x171   : > { %v713_v53 = vpop.f32.mrb[0].mxu0 }
 0x172   : > { %v1011_v54 = vadd.f32 %v713_v53, %v402_v49  ;;  %v715_v55 = vpop.f32.mrb[1].mxu0 }
 0x173   : > { %v716_v56 = vpop.f32.mrb[2].mxu0 }
 0x174   : > { %v724_v57 = vcombine.high %v1011_v54, %v1011_v54  ;;  %v728_v58 = vpack.c.bf16 %v1011_v54, %v1011_v54  ;;  %v1012_v59 = vadd.f32 %v716_v56, %v405_v51  ;;  %v718_v60 = vpop.f32.mrb[3].mxu0  ;;  %742 = sbr.rel (!%p1584_p8) target bundleno = 387 (0x183), region = 36 }
 0x176   : > { %v729_v61 = vpack.c.bf16 %v724_v57, %v724_v57  ;;  %732 = vst [vmem:[%s195_s27] sm:$0x3] %v728_v58  ;;  %v725_v62 = vcombine.high %v1012_v59, %v1012_v59  ;;  %v730_v63 = vpack.c.bf16 %v1012_v59, %v1012_v59 }
 0x178   : > { %733 = vst [vmem:[%s195_s27 + $0x2] sm:$0x3] %v729_v61  ;;  %v731_v0 = vpack.c.bf16 %v725_v62, %v725_v62  ;;  %734 = vst [vmem:[%s195_s27 + $0x4] sm:$0x3] %v730_v63 }
 0x17a   : > { %735 = vst [vmem:[%s195_s27 + $0x6] sm:$0x3] %v731_v0 }
 0x17d   : > { %v764_v1 = vld [vmem:[%s195_s27] sm:$0x3] }
 0x17e   : > { %765 = vst [vmem:[%s748_s5] sm:$0x3] %v764_v1 }
 0x17f   : > { %v766_v2 = vld [vmem:[%s195_s27 + $0x2] sm:$0x3]  ;;  %v768_v3 = vld [vmem:[%s195_s27 + $0x4] sm:$0x3] }
 0x180   : > { %767 = vst [vmem:[%s748_s5 + $0x8] sm:$0x3] %v766_v2  ;;  %769 = vst [vmem:[%s748_s5 + $0x10] sm:$0x3] %v768_v3 }
 0x181   : > { %v770_v4 = vld [vmem:[%s195_s27 + $0x6] sm:$0x3] }
 0x182   : > { %771 = vst [vmem:[%s748_s5 + $0x18] sm:$0x3] %v770_v4 }
 0x183 PF: > { %s15_s18 = sadd.s32 1, %s1272_s18   ;;  %s1585_s9 = smov %s1240_s10 }
 0x184   : > { %p12_p0 = scmp.ge.s32.totalorder %s15_s18, 10   ;;  %s1586_s10 = smov %s1373_s30 }
 0x185   : > { %s1587_s11 = smov %s1248_s12  ;;  %s1588_s12 = smov %s1252_s13 }
 0x186   : > { %s1589_s13 = smov %s1361_s25  ;;  %s1590_s14 = smov %s1264_s16 }
 0x187   : > { %s1591_s15 = smov %s1268_s17  ;;  %s1592_s16 = smov %s1595_s20 }
 0x188   : > { %s1593_s17 = smov %s1599_s21  ;;  %14 = sbr.rel (!%p12_p0) target bundleno = 6 (0x6), region = 117 }
 0x18f   :  { %812 = vsyncpa [#allocation3], 1 }
 0x190   :  { %814 = vsyncpa [#allocation3 + $0x1], 1 }

// kernel: image_decoder_forward.5
= control target key start
LH: loop header
LB: loop body
LE: loop exit
PB: predicated region body
PF: predicated region fallthrough
CT: control target
= control target key end

     0   :  { %s1425_s9 = smov 0   ;;  %s1427_s10 = smov 0   ;;  %s1677_s0 = inlined_call_operand.vmem [shape: bf16[2,10,8,192], index: 0, kind: input, shape index: {}]   ;;  %s1678_s1 = inlined_call_operand.vmem [shape: bf16[2,3,192,64], index: 1, kind: input, shape index: {}]   ;;  %s1679_s2 = inlined_call_operand.vmem [shape: bf16[16,2,8,64], index: 2, kind: output, shape index: {}]  }
   0x1   :  { %s1429_s11 = smov 0   ;;  %s1431_s12 = smov 0  }
   0x2   :  { %s1433_s13 = smov 0   ;;  %s1435_s14 = smov 0  }
   0x3   :  { %s1437_s15 = smov 0  }
   0x4 LB: > { %s27_s16 = sadd.s32 1, %s1399_s13  ;;  %s31_s17 = sadd.s32 1, %s1403_s14  ;;  %s1407_s15 = sphi %s1437_s15, %s12_s15   ;;  %s1403_s14 = sphi %s1435_s14, %s1686_s14   ;;  %s1399_s13 = sphi %s1433_s13, %s1685_s13   ;;  %s1395_s12 = sphi %s1431_s12, %s1684_s12   ;;  %s1391_s11 = sphi %s1429_s11, %s1683_s11   ;;  %s1387_s10 = sphi %s1427_s10, %s1682_s10   ;;  %s1383_s9 = sphi %s1425_s9, %s1681_s9  }
   0x5   : > { %p29_p0 = scmp.ge.s32.totalorder %s27_s16, 2  ;;  %s1045_s18 = sadd.s32 4294967295, %s1407_s15  }
   0x6   : > { %p104_p1 = scmp.ne.s32.totalorder %s1387_s10, %s1383_s9  ;;  %p105_p2 = scmp.eq.s32.totalorder %s1045_s18, 3 }
   0x7   : > { %s1688_s16 = smov (%p29_p0, %s27_s16), 0  ;;  %s1690_s17 = smov (!%p29_p0, %s31_s17), %s1403_s14 }
   0x8   : > { %s90_s19 = ssub.s32 %s1399_s13, %s1688_s16  ;;  %p33_p3 = scmp.ge.s32.totalorder %s1690_s17, 2 }
   0x9   : > { %p1049_p4 = scmp.ge.s32.totalorder %s1407_s15, 1  ;;  %p1471_p5 = por %p105_p2, %p104_p1 }
   0xa   : > { %p145_p6 = scmp.lt.s32.totalorder %s1407_s15, 5  ;;  %s1692_s17 = smov (%p33_p3, %s1690_s17), 0 }
   0xb   : > { %s89_s21 = ssub.s32 %s1403_s14, %s1692_s17  ;;  %s94_s23 = sadd.s32 1, %s1387_s10 }
   0xc   : > { %p146_p7 = pnand %p1049_p4, %p145_p6  ;;  %s91_s22 = sor.u32 %s90_s19, %s89_s21 }
   0xd   : > { %p92_p8 = scmp.eq.s32.totalorder %s91_s22, 0  ;;  %p176_p9 = scmp.lt.s32.totalorder (!%p146_p7), %s1391_s11, 1  ;;  %v1409_v0 = vmov (!%p146_p7), 0   ;;  %vm365_vm0 = vcmask (!%p146_p7), 523264   ;;  %vm866_vm1 = vcmask (!%p146_p7), 519168  }
   0xe   : > { %149 = sbr.rel (%p146_p7) target bundleno = 358 (0x166), region = 28  ;;  %378 = vmatprep.subr.bf16.mxu1 (!%p146_p7), %v1409_v0  ;;  %563 = vmatprep.subr.bf16.mxu0 (!%p146_p7), %v1409_v0  ;;  %p171_p10 = scmp.lt.s32.totalorder (!%p146_p7), %s1395_s12, 1 }
   0xf   : > { %s1482_s24 = scalar_select %p92_p8, %s1387_s10, %s94_s23  }
  0x10   : > { %s168_s7 = sand.u32 (!%p146_p7), 1, %s1383_s9  }
  0x11   : > { %s1050_s8 = sshll.u32 (!%p146_p7), %s168_s7, 5 }
  0x12   : > { %s1623_s18 = scalar_lea.vmem (!%p146_p7), [#allocation2], %s1050_s8 }
  0x15   : > { %s177_s25 = scalar_select %p176_p9, %s1391_s11, 1 }
  0x16   : > { %s172_s30 = scalar_select %p171_p10, %s1395_s12, 1 }
  0x17   : > { %s1241_s26 = smul.u32 288, %s177_s25  ;;  %s1195_s9 = sshll.u32 (%p1471_p5), %s1395_s12, 4 }
  0x18   : > { %s1240_s3 = smul.u32 80, %s172_s30  ;;  %s885_s19 = sadd.s32 (%p1471_p5), %s1391_s11, %s1195_s9 }
  0x19   : > { %s1491_s29 = scalar_lea.vmem %s1678_s1, %s1241_s26  ;;  %s1192_s21 = sshll.u32 (%p1471_p5), %s885_s19, 2 }
  0x1a   : > { %v1299_v1 = vld [vmem:[%s1491_s29 + $0x60] sm:$0xff]   ;;  %v1301_v3 = vld [vmem:[%s1491_s29 + $0x68] sm:$0xff]   ;;  %v1303_v5 = vld [vmem:[%s1491_s29 + $0x70] sm:$0xff]   ;;  %s1520_s6 = scalar_lea.vmem %s1677_s0, %s1240_s3  ;;  %s887_s23 = scalar_lea.vmem (%p1471_p5), %s1679_s2, %s1192_s21 }
  0x1b   : > { %v1300_v2 = vld [vmem:[%s1491_s29] sm:$0xff]   ;;  %379 = vmatpush1.bf16.msra.mxu1 %v1299_v1  ;;  %v1302_v4 = vld [vmem:[%s1491_s29 + $0x8] sm:$0xff]   ;;  %v1304_v6 = vld [vmem:[%s1491_s29 + $0x10] sm:$0xff]  }
  0x1c   : > { %564 = vmatpush1.bf16.msra.mxu0 %v1300_v2  ;;  %380 = vmatprep.subr.bf16.mxu1 %v1409_v0  ;;  %v1305_v7 = vld [vmem:[%s1491_s29 + $0x78] sm:$0xff]   ;;  %v1307_v9 = vld [vmem:[%s1491_s29 + $0x80] sm:$0xff]   ;;  %v1309_v11 = vld [vmem:[%s1491_s29 + $0x88] sm:$0xff]  }
  0x1d   : > { %565 = vmatprep.subr.bf16.mxu0 %v1409_v0  ;;  %v1306_v8 = vld [vmem:[%s1491_s29 + $0x18] sm:$0xff]   ;;  %v1308_v10 = vld [vmem:[%s1491_s29 + $0x20] sm:$0xff]   ;;  %v1310_v12 = vld [vmem:[%s1491_s29 + $0x28] sm:$0xff]  }
  0x1e   : > { %v1311_v13 = vld [vmem:[%s1491_s29 + $0x90] sm:$0xff]   ;;  %v1053_v15 = vld [vmem:[%s1520_s6 + $0x8] sm:$0xff]  ;;  %v188_v17 = vld [vmem:[%s1520_s6] sm:$0xff] }
  0x1f   : > { %381 = vmatpush1.bf16.msra.mxu1 %v1301_v3  ;;  %v1312_v14 = vld [vmem:[%s1491_s29 + $0x30] sm:$0xff]   ;;  %v1110_v19 = vcombine.high %v188_v17, %v1053_v15  ;;  %v1313_v20 = vld [vmem:[%s1491_s29 + $0x98] sm:$0xff]   ;;  %v1315_v22 = vld [vmem:[%s1491_s29 + $0xa0] sm:$0xff]   ;;  %v1109_v33 = vcombine.low %v188_v17, %v1053_v15 }
  0x20   : > { %566 = vmatpush1.bf16.msra.mxu0 %v1302_v4  ;;  %382 = vmatprep.subr.bf16.mxu1 %v1409_v0  ;;  %v1054_v16 = vld [vmem:[%s1520_s6 + $0x10] sm:$0xff]  ;;  %v1314_v21 = vld [vmem:[%s1491_s29 + $0x38] sm:$0xff]   ;;  %v1316_v23 = vld [vmem:[%s1491_s29 + $0x40] sm:$0xff]  }
  0x21   : > { %567 = vmatprep.subr.bf16.mxu0 %v1409_v0  ;;  %v1086_v18 = vcombine.high %v1053_v15, %v1054_v16  ;;  %1129 = vmatprep.mubr.msk.bf16.mxu0 %vm365_vm0, %v1110_v19  ;;  %v1317_v24 = vld [vmem:[%s1491_s29 + $0xa8] sm:$0xff]   ;;  %v1319_v26 = vld [vmem:[%s1491_s29 + $0xb0] sm:$0xff]   ;;  %v1321_v28 = vld [vmem:[%s1491_s29 + $0xb8] sm:$0xff]   ;;  %v1085_v30 = vcombine.low %v1053_v15, %v1054_v16 }
  0x22   : > { %v1318_v25 = vld [vmem:[%s1491_s29 + $0x48] sm:$0xff]   ;;  %v1320_v27 = vld [vmem:[%s1491_s29 + $0x50] sm:$0xff]   ;;  %v1322_v29 = vld [vmem:[%s1491_s29 + $0x58] sm:$0xff]  }
  0x23   : > { %383 = vmatpush1.bf16.msra.mxu1 %v1303_v5  ;;  %1105 = vmatprep.mubr.msk.bf16.mxu1 %vm365_vm0, %v1086_v18  ;;  %v1055_v31 = vld [vmem:[%s1520_s6 + $0x18] sm:$0xff]  ;;  %v1056_v32 = vld [vmem:[%s1520_s6 + $0x20] sm:$0xff]  ;;  %v1328_v37 = vld [vmem:[%s1491_s29 + $0xc8] sm:$0xff]  }
  0x24   : > { %568 = vmatpush1.bf16.msra.mxu0 %v1304_v6  ;;  %384 = vmatprep.subr.bf16.mxu1 %v1409_v0  ;;  %v1327_v34 = vld [vmem:[%s1491_s29 + $0xc0] sm:$0xff]   ;;  %v1088_v35 = vcombine.high %v1055_v31, %v1056_v32  ;;  %v1556_v36 = vcombine.high %v1054_v16, %v1055_v31  ;;  %v1087_v38 = vcombine.low %v1055_v31, %v1056_v32  ;;  %v1057_v39 = vld [vmem:[%s1520_s6 + $0x28] sm:$0xff]  ;;  %v1058_v40 = vld [vmem:[%s1520_s6 + $0x30] sm:$0xff] }
  0x25   : > { %569 = vmatprep.subr.bf16.mxu0 %v1409_v0  ;;  %v1329_v41 = vld [vmem:[%s1491_s29 + $0xd0] sm:$0xff]   ;;  %v1567_v42 = vcombine.low %v1054_v16, %v1055_v31  ;;  %v1090_v43 = vcombine.high %v1057_v39, %v1058_v40  ;;  %v1571_v44 = vcombine.high %v1056_v32, %v1057_v39  ;;  %v1330_v45 = vld [vmem:[%s1491_s29 + $0xd8] sm:$0xff]   ;;  %v1089_v46 = vcombine.low %v1057_v39, %v1058_v40  ;;  %v1582_v48 = vld [vmem:[%s1520_s6 + $0x40] sm:$0xff] }
  0x26   : > { %v1059_v47 = vld [vmem:[%s1520_s6 + $0x38] sm:$0xff]  ;;  %v1331_v49 = vld [vmem:[%s1491_s29 + $0xe0] sm:$0xff]   ;;  %v1113_v50 = vcombine.low %v1056_v32, %v1057_v39  ;;  %v1336_v53 = vld [vmem:[%s1491_s29 + $0xe8] sm:$0xff]  }
  0x27   : > { %385 = vmatpush1.bf16.msra.mxu1 %v1305_v7  ;;  %v1092_v51 = vcombine.high %v1059_v47, %v1582_v48  ;;  %v1116_v52 = vcombine.high %v1058_v40, %v1059_v47  ;;  %v1091_v54 = vcombine.low %v1059_v47, %v1582_v48  ;;  %v1337_v55 = vld [vmem:[%s1491_s29 + $0xf0] sm:$0xff]   ;;  %v1115_v56 = vcombine.low %v1058_v40, %v1059_v47  ;;  %v1342_v57 = vld [vmem:[%s1491_s29 + $0xf8] sm:$0xff]   ;;  %v1343_v58 = vld [vmem:[%s1491_s29 + $0x100] sm:$0xff]  }
  0x28   : > { %570 = vmatpush1.bf16.msra.mxu0 %v1306_v8  ;;  %386 = vmatprep.subr.bf16.mxu1 %v1409_v0  ;;  %v1348_v59 = vld [vmem:[%s1491_s29 + $0x108] sm:$0xff]   ;;  %v1349_v60 = vld [vmem:[%s1491_s29 + $0x110] sm:$0xff]   ;;  %v1350_v61 = vld [vmem:[%s1491_s29 + $0x118] sm:$0xff]  }
  0x29   : > { %571 = vmatprep.subr.bf16.mxu0 %v1409_v0  ;;  %v1140_v62 = vld [vmem:[%s1520_s6 + $0x48] sm:$0xff] }
  0x2a   : > { %v1172_v63 = vcombine.high %v1582_v48, %v1140_v62  ;;  %v1171_v1 = vcombine.low %v1582_v48, %v1140_v62 }
  0x2b   : > { %387 = vmatpush1.bf16.msra.mxu1 %v1307_v9 }
  0x2c   : > { %572 = vmatpush1.bf16.msra.mxu0 %v1308_v10  ;;  %388 = vmatprep.subr.bf16.mxu1 %v1409_v0 }
  0x2d   : > { %573 = vmatprep.subr.bf16.mxu0 %v1409_v0 }
  0x2f   : > { %389 = vmatpush1.bf16.msra.mxu1 %v1309_v11 }
  0x30   : > { %574 = vmatpush1.bf16.msra.mxu0 %v1310_v12  ;;  %390 = vmatprep.subr.bf16.mxu1 %v1409_v0 }
  0x31   : > { %575 = vmatprep.subr.bf16.mxu0 %v1409_v0 }
  0x33   : > { %391 = vmatpush1.bf16.msra.mxu1 %v1311_v13 }
  0x34   : > { %576 = vmatpush1.bf16.msra.mxu0 %v1312_v14  ;;  %392 = vmatprep.subr.bf16.mxu1 %v1409_v0 }
  0x35   : > { %577 = vmatprep.subr.bf16.mxu0 %v1409_v0 }
  0x37   : > { %393 = vmatpush1.bf16.msra.mxu1 %v1313_v20 }
  0x38   : > { %578 = vmatpush1.bf16.msra.mxu0 %v1314_v21  ;;  %394 = vmatprep.subr.bf16.mxu1 %v1409_v0 }
  0x39   : > { %579 = vmatprep.subr.bf16.mxu0 %v1409_v0 }
  0x3b   : > { %395 = vmatpush1.bf16.msra.mxu1 %v1315_v22 }
  0x3c   : > { %580 = vmatpush1.bf16.msra.mxu0 %v1316_v23  ;;  %396 = vmatprep.subr.bf16.mxu1 %v1409_v0 }
  0x3d   : > { %581 = vmatprep.subr.bf16.mxu0 %v1409_v0 }
  0x3f   : > { %397 = vmatpush1.bf16.msra.mxu1 %v1317_v24 }
  0x40   : > { %582 = vmatpush1.bf16.msra.mxu0 %v1318_v25  ;;  %398 = vmatprep.subr.bf16.mxu1 %v1409_v0 }
  0x41   : > { %583 = vmatprep.subr.bf16.mxu0 %v1409_v0 }
  0x43   : > { %399 = vmatpush1.bf16.msra.mxu1 %v1319_v26 }
  0x44   : > { %584 = vmatpush1.bf16.msra.mxu0 %v1320_v27  ;;  %400 = vmatprep.subr.bf16.mxu1 %v1409_v0 }
  0x45   : > { %585 = vmatprep.subr.bf16.mxu0 %v1409_v0 }
  0x47   : > { %401 = vmatpush1.bf16.msra.mxu1 %v1321_v28 }
  0x48   : > { %586 = vmatpush1.bf16.msra.mxu0 %v1322_v29  ;;  %1196 = vmatprep.subr.bf16.mxu1 %v1409_v0 }
  0x49   : > { %785 = vmatprep.subr.bf16.mxu0 %v1409_v0 }
  0x4a   : > { %411 = vmatmul.mubr.bf16.vlgmr.msra.gmra.mrb[0].mxu1 %v1085_v30 }
  0x4b   : > { %596 = vmatmul.mubr.bf16.vlgmr.msra.gmra.mrb[0].mxu0 %v1109_v33  ;;  %1208 = vmatpush1.bf16.msra.mxu1 %v1327_v34 }
  0x4c   : > { %786 = vmatpush1.bf16.msra.mxu0 %v1327_v34  ;;  %1197 = vmatprep.subr.bf16.mxu1 %v1409_v0 }
  0x4d   : > { %787 = vmatprep.subr.bf16.mxu0 %v1409_v0  ;;  %1106 = vmatprep.mubr.msk.bf16.mxu1 %vm365_vm0, %v1088_v35 }
  0x4e   : > { %1130 = vmatprep.mubr.msk.bf16.mxu0 %vm365_vm0, %v1556_v36 }
  0x4f   : > { %1209 = vmatpush1.bf16.msra.mxu1 %v1328_v37 }
  0x50   : > { %788 = vmatpush1.bf16.msra.mxu0 %v1328_v37  ;;  %1198 = vmatprep.subr.bf16.mxu1 %v1409_v0 }
  0x51   : > { %789 = vmatprep.subr.bf16.mxu0 %v1409_v0 }
  0x52   : > { %419 = vmatmul.mubr.bf16.gmra.mrb[4].mxu1 %v1087_v38 }
  0x53   : > { %1210 = vmatpush1.bf16.msra.mxu1 %v1329_v41  ;;  %604 = vmatmul.mubr.bf16.gmra.mrb[4].mxu0 %v1567_v42 }
  0x54   : > { %790 = vmatpush1.bf16.msra.mxu0 %v1329_v41  ;;  %1199 = vmatprep.subr.bf16.mxu1 %v1409_v0 }
  0x55   : > { %791 = vmatprep.subr.bf16.mxu0 %v1409_v0  ;;  %1107 = vmatprep.mubr.msk.bf16.mxu1 %vm365_vm0, %v1090_v43 }
  0x56   : > { %1131 = vmatprep.mubr.msk.bf16.mxu0 %vm365_vm0, %v1571_v44 }
  0x57   : > { %1211 = vmatpush1.bf16.msra.mxu1 %v1330_v45 }
  0x58   : > { %792 = vmatpush1.bf16.msra.mxu0 %v1330_v45  ;;  %1200 = vmatprep.subr.bf16.mxu1 %v1409_v0 }
  0x59   : > { %793 = vmatprep.subr.bf16.mxu0 %v1409_v0 }
  0x5a   : > { %427 = vmatmul.mubr.bf16.gmra.mrb[8].mxu1 %v1089_v46 }
  0x5b   : > { %1212 = vmatpush1.bf16.msra.mxu1 %v1331_v49  ;;  %612 = vmatmul.mubr.bf16.gmra.mrb[8].mxu0 %v1113_v50 }
  0x5c   : > { %794 = vmatpush1.bf16.msra.mxu0 %v1331_v49  ;;  %1201 = vmatprep.subr.bf16.mxu1 %v1409_v0 }
  0x5d   : > { %795 = vmatprep.subr.bf16.mxu0 %v1409_v0  ;;  %1108 = vmatprep.mubr.msk.bf16.mxu1 %vm365_vm0, %v1092_v51 }
  0x5e   : > { %1132 = vmatprep.mubr.msk.bf16.mxu0 %vm365_vm0, %v1116_v52 }
  0x5f   : > { %1213 = vmatpush1.bf16.msra.mxu1 %v1336_v53 }
  0x60   : > { %796 = vmatpush1.bf16.msra.mxu0 %v1336_v53  ;;  %1202 = vmatprep.subr.bf16.mxu1 %v1409_v0 }
  0x61   : > { %797 = vmatprep.subr.bf16.mxu0 %v1409_v0 }
  0x62   : > { %435 = vmatmul.mubr.bf16.gmra.mrb[12].mxu1 %v1091_v54 }
  0x63   : > { %1214 = vmatpush1.bf16.msra.mxu1 %v1337_v55  ;;  %620 = vmatmul.mubr.bf16.gmra.mrb[12].mxu0 %v1115_v56 }
  0x64   : > { %798 = vmatpush1.bf16.msra.mxu0 %v1337_v55  ;;  %1203 = vmatprep.subr.bf16.mxu1 %v1409_v0 }
  0x65   : > { %799 = vmatprep.subr.bf16.mxu0 %v1409_v0  ;;  %1185 = vmatprep.mubr.msk.bf16.mxu0 %vm365_vm0, %v1556_v36 }
  0x66   : > { %1187 = vmatprep.mubr.msk.bf16.mxu1 %vm365_vm0, %v1116_v52 }
  0x67   : > { %1215 = vmatpush1.bf16.msra.mxu1 %v1342_v57 }
  0x68   : > { %800 = vmatpush1.bf16.msra.mxu0 %v1342_v57  ;;  %1204 = vmatprep.subr.bf16.mxu1 %v1409_v0 }
  0x69   : > { %801 = vmatprep.subr.bf16.mxu0 %v1409_v0 }
  0x6b   : > { %1216 = vmatpush1.bf16.msra.mxu1 %v1343_v58 }
  0x6c   : > { %802 = vmatpush1.bf16.msra.mxu0 %v1343_v58  ;;  %1205 = vmatprep.subr.bf16.mxu1 %v1409_v0 }
  0x6d   : > { %803 = vmatprep.subr.bf16.mxu0 %v1409_v0 }
  0x6f   : > { %1217 = vmatpush1.bf16.msra.mxu1 %v1348_v59 }
  0x70   : > { %804 = vmatpush1.bf16.msra.mxu0 %v1348_v59  ;;  %1206 = vmatprep.subr.bf16.mxu1 %v1409_v0 }
  0x71   : > { %805 = vmatprep.subr.bf16.mxu0 %v1409_v0 }
  0x73   : > { %1218 = vmatpush1.bf16.msra.mxu1 %v1349_v60 }
  0x74   : > { %806 = vmatpush1.bf16.msra.mxu0 %v1349_v60  ;;  %1207 = vmatprep.subr.bf16.mxu1 %v1409_v0 }
  0x75   : > { %807 = vmatprep.subr.bf16.mxu0 %v1409_v0 }
  0x77   : > { %1219 = vmatpush1.bf16.msra.mxu1 %v1350_v61 }
  0x78   : > { %808 = vmatpush1.bf16.msra.mxu0 %v1350_v61 }
  0x7a   : > { %834 = vmatmul.mubr.bf16.vlgmr.msra.gmra.mrb[16].mxu1 %v1115_v56 }
  0x7b   : > { %818 = vmatmul.mubr.bf16.vlgmr.msra.gmra.mrb[0].mxu0 %v1567_v42  ;;  %1188 = vmatprep.mubr.msk.bf16.mxu1 %vm365_vm0, %v1172_v63 }
  0x7c   : > { %1186 = vmatprep.mubr.msk.bf16.mxu0 %vm365_vm0, %v1571_v44 }
  0x82   : > { %842 = vmatmul.mubr.bf16.gmra.mrb[20].mxu1 %v1171_v1 }
  0x83   : > { %826 = vmatmul.mubr.bf16.gmra.mrb[4].mxu0 %v1113_v50 }
 0x11d   : > { %v412_v2 = vpop.f32.mrb[0].mxu1 }
 0x11e   : > { %v414_v3 = vpop.f32.mrb[1].mxu1 }
 0x11f   : > { %v415_v4 = vpop.f32.mrb[2].mxu1 }
 0x120   : > { %v417_v0 = vpop.f32.mrb[3].mxu1 }
 0x125   : > { %v420_v5 = vpop.f32.mrb[4].mxu1 }
 0x126   : > { %v422_v6 = vpop.f32.mrb[5].mxu1 }
 0x127   : > { %v423_v7 = vpop.f32.mrb[6].mxu1 }
 0x128   : > { %v425_v8 = vpop.f32.mrb[7].mxu1 }
 0x12d   : > { %v428_v9 = vpop.f32.mrb[8].mxu1 }
 0x12e   : > { %v613_v10 = vpop.f32.mrb[8].mxu0  ;;  %v430_v11 = vpop.f32.mrb[9].mxu1 }
 0x12f   : > { %v614_v12 = vadd.f32 %v613_v10, %v428_v9  ;;  %v615_v13 = vpop.f32.mrb[9].mxu0  ;;  %v431_v14 = vpop.f32.mrb[10].mxu1 }
 0x130   : > { %v616_v15 = vpop.f32.mrb[10].mxu0  ;;  %v433_v16 = vpop.f32.mrb[11].mxu1 }
 0x131   : > { %v617_v17 = vadd.f32 %v616_v15, %v431_v14  ;;  %v618_v18 = vpop.f32.mrb[11].mxu0 }
 0x135   : > { %v436_v19 = vpop.f32.mrb[12].mxu1 }
 0x136   : > { %v621_v20 = vpop.f32.mrb[12].mxu0  ;;  %v438_v21 = vpop.f32.mrb[13].mxu1 }
 0x137   : > { %v622_v22 = vadd.f32 %v621_v20, %v436_v19  ;;  %v623_v23 = vpop.f32.mrb[13].mxu0  ;;  %v439_v24 = vpop.f32.mrb[14].mxu1 }
 0x138   : > { %v624_v25 = vpop.f32.mrb[14].mxu0  ;;  %v441_v26 = vpop.f32.mrb[15].mxu1 }
 0x139   : > { %v625_v27 = vadd.f32 %v624_v25, %v439_v24  ;;  %v626_v28 = vpop.f32.mrb[15].mxu0 }
 0x14d   : > { %v835_v29 = vpop.f32.mrb[16].mxu1 }
 0x14e   : > { %v819_v30 = vpop.f32.mrb[0].mxu0  ;;  %v854_v31 = vadd.f32 %v835_v29, %v614_v12  ;;  %v837_v32 = vpop.f32.mrb[17].mxu1 }
 0x14f   : > { %v1220_v33 = vadd.f32 %v819_v30, %v412_v2  ;;  %v821_v34 = vpop.f32.mrb[1].mxu0  ;;  %v838_v35 = vpop.f32.mrb[18].mxu1 }
 0x150   : > { %v862_v36 = vpack.c.bf16 %v854_v31, %v854_v31  ;;  %v822_v37 = vpop.f32.mrb[2].mxu0  ;;  %v855_v38 = vadd.f32 %v838_v35, %v617_v17  ;;  %v840_v39 = vpop.f32.mrb[19].mxu1 }
 0x151   : > { %v858_v40 = vpack.c.bf16 %v1220_v33, %v1220_v33  ;;  %v1221_v41 = vadd.f32 %v822_v37, %v415_v4  ;;  %v824_v42 = vpop.f32.mrb[3].mxu0 }
 0x152   : > { %871 = vst.msk [vmem:[%s1623_s18 + $0x10] sm:$0xf] %vm866_vm1, %v862_v36  ;;  %v863_v43 = vpack.c.bf16 %v855_v38, %v855_v38 }
 0x153   : > { %867 = vst.msk [vmem:[%s1623_s18] sm:$0xf] %vm866_vm1, %v858_v40  ;;  %v859_v44 = vpack.c.bf16 %v1221_v41, %v1221_v41 }
 0x154   : > { %872 = vst.msk [vmem:[%s1623_s18 + $0x14] sm:$0xf] %vm866_vm1, %v863_v43 }
 0x155   : > { %868 = vst.msk [vmem:[%s1623_s18 + $0x4] sm:$0xf] %vm866_vm1, %v859_v44  ;;  %v843_v45 = vpop.f32.mrb[20].mxu1 }
 0x156   : > { %v827_v46 = vpop.f32.mrb[4].mxu0  ;;  %v856_v47 = vadd.f32 %v843_v45, %v622_v22  ;;  %v845_v48 = vpop.f32.mrb[21].mxu1 }
 0x157   : > { %v1222_v49 = vadd.f32 %v827_v46, %v420_v5  ;;  %v829_v50 = vpop.f32.mrb[5].mxu0  ;;  %v846_v51 = vpop.f32.mrb[22].mxu1  ;;  %881 = sbr.rel (!%p1471_p5) target bundleno = 358 (0x166), region = 32 }
 0x158   : > { %v864_v52 = vpack.c.bf16 %v856_v47, %v856_v47  ;;  %v830_v53 = vpop.f32.mrb[6].mxu0  ;;  %v857_v54 = vadd.f32 %v846_v51, %v625_v27  ;;  %v848_v55 = vpop.f32.mrb[23].mxu1 }
 0x159   : > { %v860_v56 = vpack.c.bf16 %v1222_v49, %v1222_v49  ;;  %v1223_v57 = vadd.f32 %v830_v53, %v423_v7  ;;  %v832_v58 = vpop.f32.mrb[7].mxu0  ;;  %v911_v2 = vld [vmem:[%s1623_s18 + $0x10] sm:$0xf] (%p1471_p5) }
 0x15a   : > { %873 = vst.msk [vmem:[%s1623_s18 + $0x18] sm:$0xf] %vm866_vm1, %v864_v52  ;;  %v865_v59 = vpack.c.bf16 %v857_v54, %v857_v54  ;;  %v903_v61 = vld [vmem:[%s1623_s18] sm:$0xf] (%p1471_p5)  ;;  %912 = vst [vmem:[%s887_s23 + $0x20] sm:$0xf] (%p1471_p5), %v911_v2 }
 0x15b   : > { %869 = vst.msk [vmem:[%s1623_s18 + $0x8] sm:$0xf] %vm866_vm1, %v860_v56  ;;  %v861_v60 = vpack.c.bf16 %v1223_v57, %v1223_v57  ;;  %v913_v3 = vld [vmem:[%s1623_s18 + $0x14] sm:$0xf] (%p1471_p5)  ;;  %904 = vst [vmem:[%s887_s23] sm:$0xf] (%p1471_p5), %v903_v61 }
 0x15c   : > { %874 = vst.msk [vmem:[%s1623_s18 + $0x1c] sm:$0xf] %vm866_vm1, %v865_v59  ;;  %v905_v62 = vld [vmem:[%s1623_s18 + $0x4] sm:$0xf] (%p1471_p5)  ;;  %914 = vst [vmem:[%s887_s23 + $0x28] sm:$0xf] (%p1471_p5), %v913_v3 }
 0x15d   : > { %870 = vst.msk [vmem:[%s1623_s18 + $0xc] sm:$0xf] %vm866_vm1, %v861_v60  ;;  %906 = vst [vmem:[%s887_s23 + $0x8] sm:$0xf] (%p1471_p5), %v905_v62 }
 0x161   : > { %v915_v4 = vld [vmem:[%s1623_s18 + $0x18] sm:$0xf] }
 0x162   : > { %v907_v63 = vld [vmem:[%s1623_s18 + $0x8] sm:$0xf]  ;;  %916 = vst [vmem:[%s887_s23 + $0x30] sm:$0xf] %v915_v4 }
 0x163   : > { %v917_v0 = vld [vmem:[%s1623_s18 + $0x1c] sm:$0xf]  ;;  %908 = vst [vmem:[%s887_s23 + $0x10] sm:$0xf] %v907_v63 }
 0x164   : > { %v909_v1 = vld [vmem:[%s1623_s18 + $0xc] sm:$0xf]  ;;  %918 = vst [vmem:[%s887_s23 + $0x38] sm:$0xf] %v917_v0 }
 0x165   : > { %910 = vst [vmem:[%s887_s23 + $0x18] sm:$0xf] %v909_v1 }
 0x166 PF: > { %s12_s15 = sadd.s32 1, %s1407_s15   ;;  %s1681_s9 = smov %s1387_s10 }
 0x167   : > { %p9_p11 = scmp.ge.s32.totalorder %s12_s15, 6   ;;  %s1682_s10 = smov %s1482_s24 }
 0x168   : > { %s1683_s11 = smov %s1399_s13  ;;  %s1684_s12 = smov %s1403_s14 }
 0x169   : > { %s1685_s13 = smov %s1688_s16  ;;  %s1686_s14 = smov %s1692_s17 }
 0x16a   :  { %11 = sbr.rel (!%p9_p11) target bundleno = 4 (0x4), region = 107 }

// kernel: image_decoder_forward.8
= control target key start
LH: loop header
LB: loop body
LE: loop exit
PB: predicated region body
PF: predicated region fallthrough
CT: control target
= control target key end

     0   :  { %s964_s15 = smov 0   ;;  %s966_s16 = smov 0   ;;  %s1050_s0 = inlined_call_operand.vmem [shape: bf16[2,16,512], index: 0, kind: input, shape index: {}]   ;;  %s1051_s1 = inlined_call_operand.vmem [shape: bf16[2,16,512], index: 1, kind: input, shape index: {}]   ;;  %s1052_s2 = inlined_call_operand.vmem [shape: bf16[2,16,512], index: 2, kind: input, shape index: {}]   ;;  %s1053_s3 = inlined_call_operand.vmem [shape: bf16[2,16,512], index: 3, kind: output, shape index: {0}]   ;;  %s1054_s4 = inlined_call_operand.vmem [shape: f32[2,1,2,512], index: 4, kind: output, shape index: {1}]  }
   0x1   :  { %s968_s17 = smov 0  }
   0x2 LB: > { %s34_s18 = sadd.s32 1, %s932_s16  ;;  %p862_p0 = scmp.ge.s32.totalorder %s936_s17, 1  ;;  %s936_s17 = sphi %s968_s17, %s15_s17   ;;  %s932_s16 = sphi %s966_s16, %s1056_s16   ;;  %s928_s15 = sphi %s964_s15, %s1055_s15  }
   0x3   : > { %p36_p1 = scmp.ge.s32.totalorder %s34_s18, 2  ;;  %p257_p2 = scmp.lt.s32.totalorder %s936_s17, 3 }
   0x5   : > { %s1058_s18 = smov (%p36_p1, %s34_s18), 0  ;;  %p258_p3 = pnand %p862_p0, %p257_p2 }
   0x6   : > { %p344_p4 = scmp.lt.s32.totalorder (!%p258_p3), %s928_s15, 1  ;;  %v938_v0 = vmov (!%p258_p3), 1966171168   ;;  %v537_v2 = vlaneseq (!%p258_p3) }
   0x7   : > { %261 = sbr.rel (%p258_p3) target bundleno = 59 (0x3b), region = 32  ;;  %v535_v1 = vunpack.c.l.s4 (!%p258_p3), %v938_v0 }
   0x8   : > { %v538_v7 = vshrl.u32 (!%p258_p3), %v537_v2, 7  ;;  %vm559_vm0 = vcmp.lt.s32.totalorder (!%p258_p3), %v537_v2, 512 }
   0x9   : > { %v536_v6 = vunpack.c.0.s8 (!%p258_p3), %v535_v1 }
   0xb   : > { %v1023_v42 = vsub.s32 (!%p258_p3), %v536_v6, %v538_v7 }
   0xe   : > { %s1060_s15 = smov (!%p344_p4, %s928_s15), 1 }
   0xf   : > { %s985_s19 = sshll.u32 %s1060_s15, 5  ;;  %s884_s6 = sshll.u32 %s1060_s15, 3 }
  0x10   : > { %s991_s22 = scalar_lea.vmem %s1050_s0, %s985_s19  ;;  %s997_s25 = scalar_lea.vmem %s1051_s1, %s985_s19 }
  0x11   : > { %s1003_s28 = scalar_lea.vmem %s1052_s2, %s985_s19  ;;  %v420_v3 = vld [vmem:[%s991_s22] sm:$0xff]  ;;  %v421_v5 = vld [vmem:[%s991_s22 + $0x8] sm:$0xff]  ;;  %v422_v19 = vld [vmem:[%s991_s22 + $0x10] sm:$0xff]  ;;  %s1020_s5 = scalar_lea.vmem %s1053_s3, %s985_s19 }
  0x12   : > { %v432_v4 = vld [vmem:[%s997_s25] sm:$0xff]  ;;  %v424_v8 = vunpack.c.l.bf16 %v420_v3  ;;  %v425_v9 = vunpack.c.h.bf16 %v420_v3  ;;  %v433_v13 = vld [vmem:[%s997_s25 + $0x8] sm:$0xff]  ;;  %v426_v17 = vunpack.c.l.bf16 %v421_v5  ;;  %v427_v18 = vunpack.c.h.bf16 %v421_v5  ;;  %v434_v24 = vld [vmem:[%s997_s25 + $0x10] sm:$0xff]  ;;  %s418_s9 = scalar_lea.vmem %s1054_s4, %s884_s6 }
  0x13   : > { %v436_v10 = vunpack.c.l.bf16 %v432_v4  ;;  %v437_v11 = vunpack.c.h.bf16 %v432_v4  ;;  %v452_v12 = vld [vmem:[%s1003_s28] sm:$0xff]  ;;  %v453_v14 = vld [vmem:[%s1003_s28 + $0x8] sm:$0xff]  ;;  %v438_v22 = vunpack.c.l.bf16 %v433_v13  ;;  %v439_v23 = vunpack.c.h.bf16 %v433_v13  ;;  %v454_v25 = vld [vmem:[%s1003_s28 + $0x10] sm:$0xff] }
  0x14   : > { %v456_v15 = vunpack.c.l.bf16 %v452_v12  ;;  %v457_v16 = vunpack.c.h.bf16 %v452_v12  ;;  %v458_v26 = vunpack.c.l.bf16 %v453_v14  ;;  %v459_v27 = vunpack.c.h.bf16 %v453_v14  ;;  %v423_v34 = vld [vmem:[%s991_s22 + $0x18] sm:$0xff] }
  0x15   : > { %v444_v20 = vadd.f32 %v436_v10, %v424_v8  ;;  %v445_v21 = vadd.f32 %v437_v11, %v425_v9  ;;  %v428_v28 = vunpack.c.l.bf16 %v422_v19  ;;  %v429_v29 = vunpack.c.h.bf16 %v422_v19  ;;  %v435_v39 = vld [vmem:[%s997_s25 + $0x18] sm:$0xff] }
  0x16   : > { %v446_v32 = vadd.f32 %v438_v22, %v426_v17  ;;  %v447_v33 = vadd.f32 %v439_v23, %v427_v18  ;;  %v440_v35 = vunpack.c.l.bf16 %v434_v24  ;;  %v441_v36 = vunpack.c.h.bf16 %v434_v24  ;;  %v455_v47 = vld [vmem:[%s1003_s28 + $0x18] sm:$0xff] }
  0x17   : > { %v464_v30 = vadd.f32 %v456_v15, %v444_v20  ;;  %v465_v31 = vadd.f32 %v457_v16, %v445_v21  ;;  %v460_v37 = vunpack.c.l.bf16 %v454_v25  ;;  %v461_v38 = vunpack.c.h.bf16 %v454_v25 }
  0x18   : > { %v466_v41 = vadd.f32 %v458_v26, %v446_v32  ;;  %v467_v43 = vadd.f32 %v459_v27, %v447_v33  ;;  %v448_v44 = vadd.f32 %v440_v35, %v428_v28  ;;  %v449_v45 = vadd.f32 %v441_v36, %v429_v29 }
  0x19   : > { %v885_v40 = vpack.c.bf16 %v465_v31, %v464_v30  ;;  %v430_v46 = vunpack.c.l.bf16 %v423_v34  ;;  %v562_v48 = vmul.f32 %v464_v30, %v464_v30  ;;  %v431_v49 = vunpack.c.h.bf16 %v423_v34 }
  0x1a   : > { %v442_v50 = vunpack.c.l.bf16 %v435_v39  ;;  %v443_v51 = vunpack.c.h.bf16 %v435_v39  ;;  %v563_v52 = vmul.f32 %v465_v31, %v465_v31  ;;  %v886_v53 = vpack.c.bf16 %v467_v43, %v466_v41 }
  0x1b   : > { %496 = vst [vmem:[%s1020_s5] sm:$0xff] %v885_v40  ;;  %v468_v54 = vadd.f32 %v460_v37, %v448_v44  ;;  %v469_v55 = vadd.f32 %v461_v38, %v449_v45  ;;  %v462_v58 = vunpack.c.l.bf16 %v455_v47  ;;  %v463_v59 = vunpack.c.h.bf16 %v455_v47 }
  0x1c   : > { %v450_v56 = vadd.f32 %v442_v50, %v430_v46  ;;  %v451_v57 = vadd.f32 %v443_v51, %v431_v49  ;;  %497 = vst [vmem:[%s1020_s5 + $0x8] sm:$0xff] %v886_v53  ;;  %v564_v0 = vmul.f32 %v466_v41, %v466_v41  ;;  %v565_v5 = vmul.f32 %v467_v43, %v467_v43 }
  0x1d   : > { %v887_v60 = vpack.c.bf16 %v469_v55, %v468_v54  ;;  %v500_v61 = vadd.f32 %v468_v54, %v464_v30  ;;  %v507_v62 = vadd.f32 %v469_v55, %v465_v31  ;;  %v566_v63 = vmul.f32 %v468_v54, %v468_v54 }
  0x1e   : > { %v567_v1 = vmul.f32 %v469_v55, %v469_v55  ;;  %v470_v3 = vadd.f32 %v462_v58, %v450_v56  ;;  %v471_v4 = vadd.f32 %v463_v59, %v451_v57 }
  0x1f   : > { %498 = vst [vmem:[%s1020_s5 + $0x10] sm:$0xff] %v887_v60  ;;  %v501_v6 = vrot.slane %v500_v61, 4  ;;  %v508_v7 = vrot.slane %v507_v62, 4  ;;  %v570_v8 = vadd.f32 %v566_v63, %v562_v48 }
  0x20   : > { %v577_v9 = vadd.f32 %v567_v1, %v563_v52  ;;  %v888_v10 = vpack.c.bf16 %v471_v4, %v470_v3  ;;  %v514_v11 = vadd.f32 %v470_v3, %v466_v41  ;;  %v521_v12 = vadd.f32 %v471_v4, %v467_v43 }
  0x21   : > { %v502_v13 = vadd.f32 %v501_v6, %v500_v61  ;;  %v509_v14 = vadd.f32 %v508_v7, %v507_v62  ;;  %v571_v15 = vrot.slane %v570_v8, 4  ;;  %v568_v16 = vmul.f32 %v470_v3, %v470_v3 }
  0x22   : > { %v578_v17 = vrot.slane %v577_v9, 4  ;;  %499 = vst [vmem:[%s1020_s5 + $0x18] sm:$0xff] %v888_v10  ;;  %v515_v18 = vrot.slane %v514_v11, 4  ;;  %v522_v19 = vrot.slane %v521_v12, 4  ;;  %v569_v20 = vmul.f32 %v471_v4, %v471_v4 }
  0x23   : > { %v503_v21 = vrot.slane %v502_v13, 2  ;;  %v510_v22 = vrot.slane %v509_v14, 2  ;;  %v572_v23 = vadd.f32 %v571_v15, %v570_v8  ;;  %v584_v24 = vadd.f32 %v568_v16, %v564_v0 }
  0x24   : > { %v579_v25 = vadd.f32 %v578_v17, %v577_v9  ;;  %v516_v26 = vadd.f32 %v515_v18, %v514_v11  ;;  %v523_v27 = vadd.f32 %v522_v19, %v521_v12  ;;  %v591_v28 = vadd.f32 %v569_v20, %v565_v5 }
  0x25   : > { %v585_v29 = vrot.slane %v584_v24, 4  ;;  %v504_v30 = vadd.f32 %v503_v21, %v502_v13  ;;  %v511_v31 = vadd.f32 %v510_v22, %v509_v14  ;;  %v573_v32 = vrot.slane %v572_v23, 2 }
  0x26   : > { %v517_v33 = vrot.slane %v516_v26, 2  ;;  %v524_v34 = vrot.slane %v523_v27, 2  ;;  %v592_v35 = vrot.slane %v591_v28, 4  ;;  %v580_v36 = vrot.slane %v579_v25, 2 }
  0x27   : > { %v586_v37 = vadd.f32 %v585_v29, %v584_v24  ;;  %v505_v38 = vrot.slane %v504_v30, 1  ;;  %v512_v39 = vrot.slane %v511_v31, 1  ;;  %v574_v40 = vadd.f32 %v573_v32, %v572_v23 }
  0x28   : > { %v593_v41 = vadd.f32 %v592_v35, %v591_v28  ;;  %v518_v43 = vadd.f32 %v517_v33, %v516_v26  ;;  %v525_v44 = vadd.f32 %v524_v34, %v523_v27  ;;  %v581_v45 = vadd.f32 %v580_v36, %v579_v25 }
  0x29   : > { %v506_v46 = vadd.f32 %v505_v38, %v504_v30  ;;  %v513_v47 = vadd.f32 %v512_v39, %v511_v31  ;;  %v575_v48 = vrot.slane %v574_v40, 1  ;;  %v587_v49 = vrot.slane %v586_v37, 2 }
  0x2a   : > { %v519_v50 = vrot.slane %v518_v43, 1  ;;  %v526_v51 = vrot.slane %v525_v44, 1  ;;  %v582_v52 = vrot.slane %v581_v45, 1  ;;  %v594_v53 = vrot.slane %v593_v41, 2 }
  0x2b   : > { %v532_v54 = vcombine.low %v506_v46, %v513_v47  ;;  %v576_v55 = vadd.f32 %v575_v48, %v574_v40  ;;  %v588_v56 = vadd.f32 %v587_v49, %v586_v37 }
  0x2c   : > { %v520_v57 = vadd.f32 %v519_v50, %v518_v43  ;;  %v527_v58 = vadd.f32 %v526_v51, %v525_v44  ;;  %v583_v59 = vadd.f32 %v582_v52, %v581_v45  ;;  %v595_v60 = vadd.f32 %v594_v53, %v593_v41 }
  0x2d   : > { %v589_v61 = vrot.slane %v588_v56, 1  ;;  %v540_v63 = vrot.slane %v532_v54, %v1023_v42 }
  0x2e   : > { %v533_v62 = vcombine.low %v520_v57, %v527_v58  ;;  %v596_v0 = vrot.slane %v595_v60, 1  ;;  %v602_v1 = vcombine.low %v576_v55, %v583_v59 }
  0x2f   : > { %v590_v3 = vadd.f32 %v589_v61, %v588_v56 }
  0x30   : > { %v547_v4 = vrot.slane %v533_v62, %v1023_v42  ;;  %v597_v5 = vadd.f32 %v596_v0, %v595_v60  ;;  %v610_v8 = vrot.slane %v602_v1, %v1023_v42 }
  0x32   : > { %v548_v6 = vcombine.low %v540_v63, %v547_v4  ;;  %v603_v7 = vcombine.low %v590_v3, %v597_v5 }
  0x34   : > { %v555_v9 = vrot.slane %v548_v6, %v1023_v42  ;;  %v617_v10 = vrot.slane %v603_v7, %v1023_v42 }
  0x36   : > { %561 = vst.msk [vmem:[%s418_s9] ss:$2 sm:$0xf] %vm559_vm0, %v555_v9  ;;  %v618_v11 = vcombine.low %v610_v8, %v617_v10 }
  0x38   : > { %v625_v12 = vrot.slane %v618_v11, %v1023_v42 }
  0x3a   : > { %877 = vst.msk [vmem:[%s418_s9 + $0x1] ss:$2 sm:$0xf] %vm559_vm0, %v625_v12 }
  0x3b PF: > { %s15_s17 = sadd.s32 1, %s936_s17   ;;  %s1055_s15 = smov %s932_s16 }
  0x3c   : > { %p12_p5 = scmp.ge.s32.totalorder %s15_s17, 4   ;;  %s1056_s16 = smov %s1058_s18 }
  0x3e   :  { %14 = sbr.rel (!%p12_p5) target bundleno = 2 (0x2), region = 81 }

// kernel: tile.14
= control target key start
LH: loop header
LB: loop body
LE: loop exit
PB: predicated region body
PF: predicated region fallthrough
CT: control target
= control target key end

     0   :  { %s57_s8 = smov 96   ;;  %vm3_vm0 = vcmask 261120   ;;  %s59_s15 = smov 64   ;;  %vm9_vm1 = vcmask 1048320   ;;  %vm15_vm2 = vcmask 785920   ;;  %vm21_vm3 = vcmask 523520   ;;  %s94_s0 = inlined_call_operand.vmem [shape: f32[16,32], index: 0, kind: input, shape index: {}]   ;;  %s95_s1 = inlined_call_operand.vmem [shape: f32[1,512], index: 1, kind: output, shape index: {}]  }
   0x1   :  { %v48_v0 = vld [vmem:[%s94_s0 + $0x3] ss:$4 sm:$0xf]   ;;  %v49_v1 = vld [vmem:[%s94_s0 + $0x2] ss:$4 sm:$0xf]  }
   0x2   :  { %7 = vrot.lane.b32.xlu0 %v48_v0, %s57_s8  ;;  %v50_v2 = vld [vmem:[%s94_s0 + $0x1] ss:$4 sm:$0xf]   ;;  %v2_v3 = vld [vmem:[%s94_s0] ss:$4 sm:$0xf]  }
   0x3   :  { %s58_s0 = smov 32   ;;  %4 = vst.msk [vmem:[#allocation0] ss:$8 sm:$0xf] %vm3_vm0, %v2_v3  }
   0x4   :  { %19 = vrot.lane.b32.xlu1 %v50_v2, %s58_s0 }
   0x6   :  { %13 = vrot.lane.b32.xlu0 %v49_v1, %s59_s15 }
  0x74   :  { %v8_v4 = vpop.permute.xlu0 %7  }
  0x75   :  { %10 = vst.msk [vmem:[#allocation0] ss:$8 sm:$0xf] %vm9_vm1, %v8_v4  }
  0x76   :  { %v20_v5 = vpop.permute.xlu1 %19  }
  0x78   :  { %v14_v6 = vpop.permute.xlu0 %13  }
  0x79   :  { %16 = vst.msk [vmem:[#allocation0] ss:$8 sm:$0xf] %vm15_vm2, %v14_v6  }
  0x7a   :  { %22 = vst.msk [vmem:[#allocation0] ss:$8 sm:$0xf] %vm21_vm3, %v20_v5  }
  0x81   :  { %v26_v7 = vld [vmem:[#allocation0] sm:$0x1]  ;;  %v30_v8 = vld [vmem:[#allocation0 + $0x8] sm:$0x1]  ;;  %v35_v9 = vld [vmem:[#allocation0 + $0x10] sm:$0x1] }
  0x82   :  { %28 = vst [vmem:[%s95_s1] sm:$0x1] %v26_v7  ;;  %51 = vst [vmem:[%s95_s1 + $0x1] sm:$0x1] %v30_v8  ;;  %v41_v10 = vld [vmem:[#allocation0 + $0x18] sm:$0x1] }
  0x83   :  { %52 = vst [vmem:[%s95_s1 + $0x2] sm:$0x1] %v35_v9  ;;  %53 = vst [vmem:[%s95_s1 + $0x3] sm:$0x1] %v41_v10 }

// kernel: tile.13
= control target key start
LH: loop header
LB: loop body
LE: loop exit
PB: predicated region body
PF: predicated region fallthrough
CT: control target
= control target key end

     0   :  { %s28_s0 = inlined_call_operand.vmem [shape: f32[32], index: 0, kind: input, shape index: {}]   ;;  %s29_s1 = inlined_call_operand.vmem [shape: f32[16,32], index: 1, kind: output, shape index: {}]  }
   0x1   :  { %v4_v0 = vld [vmem:[%s28_s0] ss:$0 sm:$0xff] }
   0x2   :  { %5 = vst [vmem:[%s29_s1] sm:$0xff] %v4_v0  ;;  %8 = vst [vmem:[%s29_s1 + $0x8] sm:$0xff] %v4_v0 }

// kernel: image_decoder_forward.7
= control target key start
LH: loop header
LB: loop body
LE: loop exit
PB: predicated region body
PF: predicated region fallthrough
CT: control target
= control target key end

     0   :  { %7 = vsyncpa [#allocation3], 0  ;;  %s2733_s0 = inlined_call_operand.vmem [shape: bf16[2,4,2,384], index: 0, kind: input, shape index: {}]   ;;  %s2734_s1 = inlined_call_operand.hbm [shape: bf16[8,3,384,256], index: 1, kind: input, shape index: {}]   ;;  %s2735_s2 = inlined_call_operand.vmem [shape: bf16[4,8,2,256], index: 2, kind: output, shape index: {}]  }
   0x1   :  { %9 = vsyncpa [#allocation3 + $0x1], 0  ;;  %s2362_s9 = smov 0   ;;  %s2364_s10 = smov 0  }
   0x2   :  { %s2366_s11 = smov 0   ;;  %s2368_s12 = smov 0  }
   0x3   :  { %s2370_s13 = smov 0   ;;  %s2372_s14 = smov 0  }
   0x4   :  { %s2374_s15 = smov 0   ;;  %s2376_s16 = smov 0  }
   0x5   :  { %s2378_s17 = smov 0   ;;  %s2380_s18 = smov 0  }
   0x6 LB: > { %s1639_s19 = sadd.s32 4294967295, %s2339_s18   ;;  %s30_s20 = sadd.s32 1, %s2331_s16  ;;  %s2339_s18 = sphi %s2380_s18, %s15_s18   ;;  %s2335_s17 = sphi %s2378_s17, %s2750_s17   ;;  %s2331_s16 = sphi %s2376_s16, %s2749_s16   ;;  %s2327_s15 = sphi %s2374_s15, %s2748_s15   ;;  %s2323_s14 = sphi %s2372_s14, %s2747_s14   ;;  %s2319_s13 = sphi %s2370_s13, %s2746_s13   ;;  %s2315_s12 = sphi %s2368_s12, %s2745_s12   ;;  %s2311_s11 = sphi %s2366_s11, %s2744_s11   ;;  %s2307_s10 = sphi %s2364_s10, %s2743_s10   ;;  %s2303_s9 = sphi %s2362_s9, %s2742_s9  }
   0x7   : > { %p32_p0 = scmp.ge.s32.totalorder %s30_s20, 8  ;;  %s34_s21 = sadd.s32 1, %s2335_s17 }
   0x8   : > { %s67_s22 = sadd.s32 1, %s2319_s13  ;;  %p74_p1 = scmp.ne.s32.totalorder %s2319_s13, %s2315_s12 }
   0x9   : > { %s2752_s20 = smov (%p32_p0, %s30_s20), 0  ;;  %s2754_s21 = smov (!%p32_p0, %s34_s21), %s2335_s17 }
   0xa   : > { %s64_s23 = ssub.s32 %s2331_s16, %s2752_s20  ;;  %p75_p2 = scmp.eq.s32.totalorder %s2339_s18, 0 }
   0xb   : > { %p36_p3 = scmp.ge.s32.totalorder %s2754_s21, 2  ;;  %p65_p4 = scmp.eq.s32.totalorder %s64_s23, 0 }
   0xc   : > { %p2422_p5 = por %p75_p2, %p74_p1  ;;  %p80_p6 = scmp.ne.s32.totalorder %s2315_s12, %s2311_s11 }
   0xd   : > { %s2756_s21 = smov (%p36_p3, %s2754_s21), 0  ;;  %p81_p7 = scmp.eq.s32.totalorder %s1639_s19, 0 }
   0xe   : > { %s2430_s25 = scalar_select %p65_p4, %s2319_s13, %s67_s22  }
   0xf   : > { %s92_s26 = ssub.s32 %s2335_s17, %s2756_s21  ;;  %s97_s28 = sadd.s32 1, %s2307_s10 }
  0x10   : > { %s94_s27 = sor.u32 %s92_s26, %s64_s23  ;;  %p2435_p8 = por %p81_p7, %p80_p6 }
  0x11   : > { %p95_p9 = scmp.eq.s32.totalorder %s94_s27, 0  ;;  %p107_p10 = scmp.ne.s32.totalorder %s2307_s10, %s2303_s9 }
  0x12   : > { %p108_p11 = scmp.eq.s32.totalorder %s1639_s19, 15  ;;  %p1925_p13 = scmp.lt.s32.totalorder %s2339_s18, 16 }
  0x13   : > { %s2442_s30 = scalar_select %p95_p9, %s2307_s10, %s97_s28  }
  0x14   : > { %p2444_p12 = por %p108_p11, %p107_p10  ;;  %s141_s4 = sand.u32 1, %s2319_s13  }
  0x15   : > { %s1915_s5 = smul.u32 1152, %s141_s4  ;;  %p2453_p0 = pnand %p1925_p13, %p2422_p5 }
  0x16   : > { %s2738_s3 = scalar_select %p2444_p12, 1, 0 }
  0x17   : > { %s1916_s6 = smul.u32 18432, %s2331_s16  ;;  %s145_s22 = scalar_lea.vmem [#allocation2], %s1915_s5 }
  0x18   : > { %s152_s23 = sshll.u32 %s145_s22, 4  ;;  %s2465_s24 = scalar_lea.sflag [#allocation3], %s141_s4  ;;  %s2462_s23 = int_to_ptr.vmem [resolvable:$true] %s152_s23 }
  0x19   : > { %s2460_s19 = scalar_lea.hbm %s2734_s1, %s1916_s6  ;;  %p2229_p3 = pneg %p2453_p0 }
  0x1a   : > { %s2227_s26 = scalar_lea.hbm %s2460_s19, 18432  ;;  %s2232_s6 = scalar_lea.hbm %s2734_s1, 147456 }
  0x1b   : > { %p2228_p2 = scmp.ne.s32.totalorder %s2460_s19, %s2227_s26  ;;  %p2233_p6 = scmp.lt.u32.totalorder %s2460_s19, %s2734_s1 }
  0x1c   : > { %p2234_p7 = scmp.lt.u32.totalorder %s2232_s6, %s2227_s26  ;;  %p2236_p10 = scmp.lt.u32.totalorder %s2227_s26, %s2460_s19 }
  0x1d   : > { %p2230_p4 = pnand %p2229_p3, %p2228_p2 }
  0x1e   : > { %p2235_p9 = por %p2234_p7, %p2233_p6 }
  0x1f   : > { %p2231_p5 = pneg %p2230_p4 }
  0x20   : > { %p2237_p11 = por %p2236_p10, %p2235_p9 }
  0x22   : > { %p2238_p13 = pnand %p2237_p11, %p2231_p5 }
  0x24   : > { %2241 = shalt.err (!%p2238_p13)
}
  0x25   : > { %s2242_s4 = scalar_lea.vmem %s2462_s23, 18432  ;;  %s2341_s11 = smov [#allocation2]  }
  0x26   : > { %p2243_p2 = scmp.ne.s32.totalorder %s2462_s23, %s2242_s4  ;;  %s2247_s22 = sshll.u32 %s2341_s11, 4  ;;  %s2248_s22 = int_to_ptr.vmem [resolvable:$false] %s2247_s22 }
  0x27   : > { %s2249_s27 = scalar_lea.vmem %s2248_s22, 36864  ;;  %p2250_p12 = scmp.lt.s32.totalorder %s2462_s23, %s2248_s22 }
  0x28   : > { %p2245_p4 = pnand %p2243_p2, %p2229_p3  ;;  %p2251_p6 = scmp.lt.s32.totalorder %s2249_s27, %s2242_s4 }
  0x2a   : > { %p2246_p1 = pneg %p2245_p4  ;;  %p2252_p7 = por %p2251_p6, %p2250_p12 }
  0x2c   : > { %p2253_p9 = pnand %p2252_p7, %p2246_p1 }
  0x2e   : > { %2256 = shalt.err (!%p2253_p9)
}
  0x2f   : > { %s2342_s26 = smov 128   ;;  %s2343_s28 = smov 8  }
  0x30   : > { %1924 = dma.hbm_to_vmem [thread:$0]  (!%p2453_p0), %s2460_s19, 18432, %s2462_s23, %s2465_s24, %s2342_s26, %s2342_s26, %s2343_s28  }
  0x31   : > { %p160_p3 = scmp.lt.s32.totalorder %s2339_s18, 17  ;;  %p2740_p5 = scmp.ge.s32.totalorder %s2339_s18, 1 }
  0x33   : > { %p161_p10 = pnand %p2740_p5, %p160_p3 }
  0x34   : > { %s166_s6 = sand.u32 (!%p161_p10), 1, %s2315_s12  }
  0x35   : > { %164 = sbr.rel (%p161_p10) target bundleno = 461 (0x1cd), region = 28  ;;  %s167_s5 = scalar_lea.sflag (!%p161_p10), [#allocation3], %s166_s6 }
  0x36   : > { %s1917_s8 = smul.u32 (!%p161_p10), 1152, %s166_s6 }
  0x38   : > { %s2497_s4 = scalar_lea.vmem (!%p161_p10), [#allocation2], %s1917_s8 }
  0x3c   : > { %2298 = dma.done.wait (%p2435_p8), %s167_s5, 18432  }
  0x3d   : > { %2300 = vsyncadd (%p2435_p8), %s167_s5, 4294948864  ;;  %v2344_v0 = vmov 0   ;;  %v2011_v1 = vld [vmem:[%s2497_s4 + $0x184] ss:$8 sps:$4 sm:$0xff]   ;;  %v2015_v3 = vld [vmem:[%s2497_s4 + $0x180] ss:$8 sps:$4 sm:$0xff]   ;;  %v314_v21 = vlaneseq }
  0x3e   : > { %650 = vmatprep.mubr.bf16.mxu0 %v2344_v0  ;;  %v2013_v2 = vld [vmem:[%s2497_s4 + $0x284] ss:$8 sps:$4 sm:$0xff]   ;;  %577 = vmatprep.subr.bf16.mxu1 %v2011_v1  ;;  %v2016_v4 = vld [vmem:[%s2497_s4 + $0x280] ss:$8 sps:$4 sm:$0xff]   ;;  %v2017_v5 = vld [vmem:[%s2497_s4 + $0x194] ss:$8 sps:$4 sm:$0xff]  }
  0x3f   : > { %618 = vmatprep.subr.bf16.mxu0 %v2013_v2  ;;  %578 = vmatpush1.bf16.msra.mxu1 %v2015_v3  ;;  %v2019_v6 = vld [vmem:[%s2497_s4 + $0x294] ss:$8 sps:$4 sm:$0xff]   ;;  %v2021_v7 = vld [vmem:[%s2497_s4 + $0x190] ss:$8 sps:$4 sm:$0xff]   ;;  %v2023_v9 = vld [vmem:[%s2497_s4 + $0x1a4] ss:$8 sps:$4 sm:$0xff]  }
  0x40   : > { %619 = vmatpush1.bf16.msra.mxu0 %v2016_v4  ;;  %579 = vmatprep.subr.bf16.mxu1 %v2017_v5  ;;  %v2022_v8 = vld [vmem:[%s2497_s4 + $0x290] ss:$8 sps:$4 sm:$0xff]   ;;  %p194_p8 = scmp.lt.s32.totalorder %s2327_s15, 1  ;;  %v2025_v10 = vld [vmem:[%s2497_s4 + $0x2a4] ss:$8 sps:$4 sm:$0xff]   ;;  %v2528_v27 = vshrl.u32 %v314_v21, 7 }
  0x41   : > { %620 = vmatprep.subr.bf16.mxu0 %v2019_v6  ;;  %v2027_v11 = vld [vmem:[%s2497_s4 + $0x1a0] ss:$8 sps:$4 sm:$0xff]   ;;  %v2029_v13 = vld [vmem:[%s2497_s4 + $0x1b4] ss:$8 sps:$4 sm:$0xff]   ;;  %v2033_v15 = vld [vmem:[%s2497_s4 + $0x1b0] ss:$8 sps:$4 sm:$0xff]  }
  0x42   : > { %v2028_v12 = vld [vmem:[%s2497_s4 + $0x2a0] ss:$8 sps:$4 sm:$0xff]   ;;  %v2031_v14 = vld [vmem:[%s2497_s4 + $0x2b4] ss:$8 sps:$4 sm:$0xff]   ;;  %s195_s29 = scalar_select %p194_p8, %s2327_s15, 1 }
  0x43   : > { %580 = vmatpush1.bf16.msra.mxu1 %v2021_v7  ;;  %v2034_v16 = vld [vmem:[%s2497_s4 + $0x2b0] ss:$8 sps:$4 sm:$0xff]   ;;  %v2035_v17 = vld [vmem:[%s2497_s4 + $0x1c4] ss:$8 sps:$4 sm:$0xff]   ;;  %v2345_v19 = vmov 1966171168  }
  0x44   : > { %621 = vmatpush1.bf16.msra.mxu0 %v2022_v8  ;;  %581 = vmatprep.subr.bf16.mxu1 %v2023_v9  ;;  %v2037_v18 = vld [vmem:[%s2497_s4 + $0x2c4] ss:$8 sps:$4 sm:$0xff]   ;;  %v312_v20 = vunpack.c.l.s4 %v2345_v19  ;;  %v2039_v22 = vld [vmem:[%s2497_s4 + $0x1c0] ss:$8 sps:$4 sm:$0xff]   ;;  %s1918_s7 = smul.u32 12, %s195_s29  ;;  %s191_s11 = sand.u32 1, %s2303_s9  }
  0x45   : > { %622 = vmatprep.subr.bf16.mxu0 %v2025_v10  ;;  %v2040_v23 = vld [vmem:[%s2497_s4 + $0x2c0] ss:$8 sps:$4 sm:$0xff]   ;;  %v2041_v24 = vld [vmem:[%s2497_s4 + $0x1d4] ss:$8 sps:$4 sm:$0xff]   ;;  %v2045_v28 = vld [vmem:[%s2497_s4 + $0x1d0] ss:$8 sps:$4 sm:$0xff]  }
  0x46   : > { %v2043_v25 = vld [vmem:[%s2497_s4 + $0x2d4] ss:$8 sps:$4 sm:$0xff]   ;;  %v313_v26 = vunpack.c.0.s8 %v312_v20  ;;  %s2534_s24 = scalar_lea.vmem %s2733_s0, %s1918_s7  ;;  %v2046_v29 = vld [vmem:[%s2497_s4 + $0x2d0] ss:$8 sps:$4 sm:$0xff]   ;;  %v2047_v30 = vld [vmem:[%s2497_s4 + $0x1e4] ss:$8 sps:$4 sm:$0xff]  }
  0x47   : > { %582 = vmatpush1.bf16.msra.mxu1 %v2027_v11  ;;  %v2049_v31 = vld [vmem:[%s2497_s4 + $0x2e4] ss:$8 sps:$4 sm:$0xff]   ;;  %v2051_v35 = vld [vmem:[%s2497_s4 + $0x1e0] ss:$8 sps:$4 sm:$0xff]   ;;  %v2053_v38 = vld [vmem:[%s2497_s4 + $0x1f4] ss:$8 sps:$4 sm:$0xff]  }
  0x48   : > { %623 = vmatpush1.bf16.msra.mxu0 %v2028_v12  ;;  %583 = vmatprep.subr.bf16.mxu1 %v2029_v13  ;;  %v2540_v32 = vsub.s32 %v313_v26, %v2528_v27  ;;  %v1646_v33 = vld [vmem:[%s2534_s24 + $0x3] sm:$0x7]  ;;  %v1647_v34 = vld [vmem:[%s2534_s24 + $0x6] sm:$0x7]  ;;  %v2055_v39 = vld [vmem:[%s2497_s4 + $0x2f4] ss:$8 sps:$4 sm:$0xff]  }
  0x49   : > { %624 = vmatprep.subr.bf16.mxu0 %v2031_v14  ;;  %v310_v36 = vcombine.low %v1646_v33, %v1647_v34  ;;  %v2052_v37 = vld [vmem:[%s2497_s4 + $0x2e0] ss:$8 sps:$4 sm:$0xff]   ;;  %v2057_v41 = vld [vmem:[%s2497_s4 + $0x1f0] ss:$8 sps:$4 sm:$0xff]   ;;  %v2059_v45 = vld [vmem:[%s2497_s4 + $0x204] ss:$8 sps:$4 sm:$0xff]  }
  0x4a   : > { %v2058_v44 = vld [vmem:[%s2497_s4 + $0x2f0] ss:$8 sps:$4 sm:$0xff]   ;;  %v2063_v46 = vld [vmem:[%s2497_s4 + $0x104] ss:$8 sps:$4 sm:$0xff]   ;;  %v2061_v49 = vld [vmem:[%s2497_s4 + $0x100] ss:$8 sps:$4 sm:$0xff]  }
  0x4b   : > { %584 = vmatpush1.bf16.msra.mxu1 %v2033_v15  ;;  %v317_v40 = vrot.slane %v310_v36, %v2540_v32  ;;  %v2064_v50 = vld [vmem:[%s2497_s4 + $0x200] ss:$8 sps:$4 sm:$0xff]   ;;  %v2065_v51 = vld [vmem:[%s2497_s4 + $0x214] ss:$8 sps:$4 sm:$0xff]   ;;  %v2067_v53 = vld [vmem:[%s2497_s4 + $0x110] ss:$8 sps:$4 sm:$0xff]  }
  0x4c   : > { %625 = vmatpush1.bf16.msra.mxu0 %v2034_v16  ;;  %585 = vmatprep.subr.bf16.mxu1 %v2035_v17  ;;  %v2069_v52 = vld [vmem:[%s2497_s4 + $0x114] ss:$8 sps:$4 sm:$0xff]   ;;  %v2070_v54 = vld [vmem:[%s2497_s4 + $0x210] ss:$8 sps:$4 sm:$0xff]   ;;  %v2071_v55 = vld [vmem:[%s2497_s4 + $0x224] ss:$8 sps:$4 sm:$0xff]  }
  0x4d   : > { %626 = vmatprep.subr.bf16.mxu0 %v2037_v18  ;;  %v2551_v42 = vrot.slane %v317_v40, %v2540_v32  ;;  %v318_v43 = vcombine.high %v317_v40, %v317_v40  ;;  %v2075_v56 = vld [vmem:[%s2497_s4 + $0x124] ss:$8 sps:$4 sm:$0xff]   ;;  %v2073_v57 = vld [vmem:[%s2497_s4 + $0x120] ss:$8 sps:$4 sm:$0xff]   ;;  %v2077_v59 = vld [vmem:[%s2497_s4 + $0x234] ss:$8 sps:$4 sm:$0xff]  }
  0x4e   : > { %v2076_v58 = vld [vmem:[%s2497_s4 + $0x220] ss:$8 sps:$4 sm:$0xff]   ;;  %v2081_v60 = vld [vmem:[%s2497_s4 + $0x134] ss:$8 sps:$4 sm:$0xff]   ;;  %v2079_v61 = vld [vmem:[%s2497_s4 + $0x130] ss:$8 sps:$4 sm:$0xff]  }
  0x4f   : > { %586 = vmatpush1.bf16.msra.mxu1 %v2039_v22  ;;  %v332_v47 = vrot.slane %v318_v43, %v2540_v32  ;;  %v333_v48 = vcombine.high %v2551_v42, %v2551_v42  ;;  %v2082_v62 = vld [vmem:[%s2497_s4 + $0x230] ss:$8 sps:$4 sm:$0xff]   ;;  %v2083_v63 = vld [vmem:[%s2497_s4 + $0x244] ss:$8 sps:$4 sm:$0xff]   ;;  %v2085_v2 = vld [vmem:[%s2497_s4 + $0x140] ss:$8 sps:$4 sm:$0xff]  }
  0x50   : > { %627 = vmatpush1.bf16.msra.mxu0 %v2040_v23  ;;  %587 = vmatprep.subr.bf16.mxu1 %v2041_v24  ;;  %v2087_v1 = vld [vmem:[%s2497_s4 + $0x144] ss:$8 sps:$4 sm:$0xff]   ;;  %v2088_v3 = vld [vmem:[%s2497_s4 + $0x240] ss:$8 sps:$4 sm:$0xff]   ;;  %v2089_v4 = vld [vmem:[%s2497_s4 + $0x254] ss:$8 sps:$4 sm:$0xff]  }
  0x51   : > { %628 = vmatprep.subr.bf16.mxu0 %v2043_v25  ;;  %609 = vmatprep.mubr.bf16.mxu1 %v332_v47  ;;  %v204_v5 = vld [vmem:[%s2534_s24] sm:$0x7]  ;;  %v205_v6 = vld [vmem:[%s2534_s24 + $0x3] sm:$0x7]  ;;  %v2093_v7 = vld [vmem:[%s2497_s4 + $0x154] ss:$8 sps:$4 sm:$0xff]  }
  0x52   : > { %v2091_v8 = vld [vmem:[%s2497_s4 + $0x150] ss:$8 sps:$4 sm:$0xff]   ;;  %v661_v10 = vcombine.low %v204_v5, %v205_v6  ;;  %v2095_v11 = vld [vmem:[%s2497_s4 + $0x264] ss:$8 sps:$4 sm:$0xff]   ;;  %v2097_v13 = vld [vmem:[%s2497_s4 + $0x160] ss:$8 sps:$4 sm:$0xff]  }
  0x53   : > { %588 = vmatpush1.bf16.msra.mxu1 %v2045_v28  ;;  %v2094_v9 = vld [vmem:[%s2497_s4 + $0x250] ss:$8 sps:$4 sm:$0xff]   ;;  %v2099_v12 = vld [vmem:[%s2497_s4 + $0x164] ss:$8 sps:$4 sm:$0xff]   ;;  %v2100_v14 = vld [vmem:[%s2497_s4 + $0x260] ss:$8 sps:$4 sm:$0xff]  }
  0x54   : > { %629 = vmatpush1.bf16.msra.mxu0 %v2046_v29  ;;  %589 = vmatprep.subr.bf16.mxu1 %v2047_v30  ;;  %v668_v15 = vrot.slane %v661_v10, %v2540_v32  ;;  %v2101_v16 = vld [vmem:[%s2497_s4 + $0x274] ss:$8 sps:$4 sm:$0xff]   ;;  %v2103_v18 = vld [vmem:[%s2497_s4 + $0x170] ss:$8 sps:$4 sm:$0xff]   ;;  %v2109_v21 = vld [vmem:[%s2497_s4 + $0x4] ss:$8 sps:$4 sm:$0xff]  }
  0x55   : > { %630 = vmatprep.subr.bf16.mxu0 %v2049_v31  ;;  %v2105_v17 = vld [vmem:[%s2497_s4 + $0x174] ss:$8 sps:$4 sm:$0xff]   ;;  %v2106_v19 = vld [vmem:[%s2497_s4 + $0x270] ss:$8 sps:$4 sm:$0xff]   ;;  %v2112_v22 = vld [vmem:[%s2497_s4 + $0x304] ss:$8 sps:$4 sm:$0xff]  }
  0x56   : > { %v2594_v20 = vrot.slane %v668_v15, %v2540_v32  ;;  %v669_v23 = vcombine.high %v668_v15, %v668_v15  ;;  %v2107_v24 = vld [vmem:[%s2497_s4] ss:$8 sps:$4 sm:$0xff]   ;;  %v2115_v28 = vld [vmem:[%s2497_s4 + $0x14] ss:$8 sps:$4 sm:$0xff]   ;;  %v2113_v31 = vld [vmem:[%s2497_s4 + $0x10] ss:$8 sps:$4 sm:$0xff]  }
  0x57   : > { %590 = vmatpush1.bf16.msra.mxu1 %v2051_v35  ;;  %v2110_v25 = vld [vmem:[%s2497_s4 + $0x300] ss:$8 sps:$4 sm:$0xff]   ;;  %v2118_v29 = vld [vmem:[%s2497_s4 + $0x314] ss:$8 sps:$4 sm:$0xff]   ;;  %v2116_v33 = vld [vmem:[%s2497_s4 + $0x310] ss:$8 sps:$4 sm:$0xff]  }
  0x58   : > { %631 = vmatpush1.bf16.msra.mxu0 %v2052_v37  ;;  %591 = vmatprep.subr.bf16.mxu1 %v2053_v38  ;;  %v684_v26 = vcombine.high %v2594_v20, %v2594_v20  ;;  %v683_v30 = vrot.slane %v669_v23, %v2540_v32  ;;  %v2121_v34 = vld [vmem:[%s2497_s4 + $0x24] ss:$8 sps:$4 sm:$0xff]   ;;  %v2119_v36 = vld [vmem:[%s2497_s4 + $0x20] ss:$8 sps:$4 sm:$0xff]   ;;  %v2127_v38 = vld [vmem:[%s2497_s4 + $0x34] ss:$8 sps:$4 sm:$0xff]  }
  0x59   : > { %632 = vmatprep.subr.bf16.mxu0 %v2055_v39  ;;  %v2124_v35 = vld [vmem:[%s2497_s4 + $0x324] ss:$8 sps:$4 sm:$0xff]   ;;  %v2122_v37 = vld [vmem:[%s2497_s4 + $0x320] ss:$8 sps:$4 sm:$0xff]   ;;  %v2130_v39 = vld [vmem:[%s2497_s4 + $0x334] ss:$8 sps:$4 sm:$0xff]  }
  0x5a   : > { %v2125_v40 = vld [vmem:[%s2497_s4 + $0x30] ss:$8 sps:$4 sm:$0xff]   ;;  %v2136_v43 = vld [vmem:[%s2497_s4 + $0x344] ss:$8 sps:$4 sm:$0xff]   ;;  %v2142_v47 = vld [vmem:[%s2497_s4 + $0x354] ss:$8 sps:$4 sm:$0xff]  }
  0x5b   : > { %592 = vmatpush1.bf16.msra.mxu1 %v2057_v41  ;;  %v2128_v41 = vld [vmem:[%s2497_s4 + $0x330] ss:$8 sps:$4 sm:$0xff]   ;;  %v2163_v5 = vld [vmem:[%s2497_s4 + $0x94] ss:$8 sps:$4 sm:$0xff]   ;;  %v2172_v10 = vld [vmem:[%s2497_s4 + $0x3a4] ss:$8 sps:$4 sm:$0xff]  }
  0x5c   : > { %633 = vmatpush1.bf16.msra.mxu0 %v2058_v44  ;;  %593 = vmatprep.subr.bf16.mxu1 %v2059_v45  ;;  %v2131_v44 = vld [vmem:[%s2497_s4 + $0x40] ss:$8 sps:$4 sm:$0xff]   ;;  %v2166_v6 = vld [vmem:[%s2497_s4 + $0x394] ss:$8 sps:$4 sm:$0xff]   ;;  %v2173_v15 = vld [vmem:[%s2497_s4 + $0xb0] ss:$8 sps:$4 sm:$0xff]  }
  0x5d   : > { %969 = vmatprep.subr.bf16.mxu0 %v2063_v46  ;;  %v2134_v45 = vld [vmem:[%s2497_s4 + $0x340] ss:$8 sps:$4 sm:$0xff]   ;;  %v2139_v46 = vld [vmem:[%s2497_s4 + $0x54] ss:$8 sps:$4 sm:$0xff]   ;;  %s1645_s22 = sshll.u32 %s191_s11, 2  ;;  %p2741_p12 = scmp.ne.s32.totalorder %s2738_s3, 0 }
  0x5e   : > { %v2190_v23 = vld [vmem:[%s2497_s4 + $0x3d4] ss:$8 sps:$4 sm:$0xff]   ;;  %s193_s27 = scalar_lea.vmem [#allocation4], %s1645_s22  ;;  %s1896_s9 = sshll.u32 (%p2741_p12), %s2323_s14, 1 }
  0x5f   : > { %651 = vmatmul.mubr.bf16.vlgmr.msra.gmra.mrb[0].mxu0 %v333_v48  ;;  %594 = vmatpush1.bf16.msra.mxu1 %v2064_v50  ;;  %v2137_v48 = vld [vmem:[%s2497_s4 + $0x50] ss:$8 sps:$4 sm:$0xff]   ;;  %v2145_v50 = vld [vmem:[%s2497_s4 + $0x64] ss:$8 sps:$4 sm:$0xff]   ;;  %s1900_s26 = sshll.u32 (%p2741_p12), %s2327_s15, 5 }
  0x60   : > { %970 = vmatpush1.bf16.msra.mxu0 %v2061_v49  ;;  %595 = vmatprep.subr.bf16.mxu1 %v2065_v51  ;;  %v2140_v49 = vld [vmem:[%s2497_s4 + $0x350] ss:$8 sps:$4 sm:$0xff]   ;;  %v2148_v51 = vld [vmem:[%s2497_s4 + $0x364] ss:$8 sps:$4 sm:$0xff]   ;;  %s1501_s28 = sadd.s32 (%p2741_p12), %s1900_s26, %s1896_s9 }
  0x61   : > { %971 = vmatprep.subr.bf16.mxu0 %v2069_v52  ;;  %1001 = vmatprep.mubr.bf16.mxu0 %v2344_v0  ;;  %v1792_v52 = vld [vmem:[%s2534_s24 + $0x6] sm:$0x7]  ;;  %s1502_s5 = scalar_lea.vmem (%p2741_p12), %s2735_s2, %s1501_s28 }
  0x63   : > { %596 = vmatpush1.bf16.msra.mxu1 %v2070_v54  ;;  %v2143_v54 = vld [vmem:[%s2497_s4 + $0x60] ss:$8 sps:$4 sm:$0xff]  }
  0x64   : > { %972 = vmatpush1.bf16.msra.mxu0 %v2067_v53  ;;  %597 = vmatprep.subr.bf16.mxu1 %v2071_v55  ;;  %v1793_v53 = vld [vmem:[%s2534_s24 + $0x9] sm:$0x7] }
  0x65   : > { %973 = vmatprep.subr.bf16.mxu0 %v2075_v56  ;;  %v2146_v55 = vld [vmem:[%s2497_s4 + $0x360] ss:$8 sps:$4 sm:$0xff]   ;;  %v1066_v56 = vcombine.low %v1792_v52, %v1793_v53 }
  0x67   : > { %598 = vmatpush1.bf16.msra.mxu1 %v2076_v58  ;;  %v2154_v58 = vld [vmem:[%s2497_s4 + $0x374] ss:$8 sps:$4 sm:$0xff]  }
  0x68   : > { %974 = vmatpush1.bf16.msra.mxu0 %v2073_v57  ;;  %599 = vmatprep.subr.bf16.mxu1 %v2077_v59  ;;  %v2151_v57 = vld [vmem:[%s2497_s4 + $0x74] ss:$8 sps:$4 sm:$0xff]   ;;  %v2633_v59 = vrot.slane %v1066_v56, %v2540_v32 }
  0x69   : > { %975 = vmatprep.subr.bf16.mxu0 %v2081_v60  ;;  %v2149_v60 = vld [vmem:[%s2497_s4 + $0x70] ss:$8 sps:$4 sm:$0xff]  }
  0x6b   : > { %600 = vmatpush1.bf16.msra.mxu1 %v2082_v62  ;;  %v1074_v62 = vcombine.high %v2633_v59, %v2633_v59 }
  0x6c   : > { %976 = vmatpush1.bf16.msra.mxu0 %v2079_v61  ;;  %601 = vmatprep.subr.bf16.mxu1 %v2083_v63  ;;  %v2152_v61 = vld [vmem:[%s2497_s4 + $0x370] ss:$8 sps:$4 sm:$0xff]   ;;  %v2157_v63 = vld [vmem:[%s2497_s4 + $0x84] ss:$8 sps:$4 sm:$0xff]  }
  0x6d   : > { %977 = vmatprep.subr.bf16.mxu0 %v2087_v1  ;;  %v2160_v1 = vld [vmem:[%s2497_s4 + $0x384] ss:$8 sps:$4 sm:$0xff]  }
  0x6f   : > { %602 = vmatpush1.bf16.msra.mxu1 %v2088_v3  ;;  %v2155_v3 = vld [vmem:[%s2497_s4 + $0x80] ss:$8 sps:$4 sm:$0xff]  }
  0x70   : > { %978 = vmatpush1.bf16.msra.mxu0 %v2085_v2  ;;  %603 = vmatprep.subr.bf16.mxu1 %v2089_v4  ;;  %v1088_v2 = vrot.slane %v1074_v62, %v2540_v32  ;;  %v2158_v4 = vld [vmem:[%s2497_s4 + $0x380] ss:$8 sps:$4 sm:$0xff]  }
  0x71   : > { %979 = vmatprep.subr.bf16.mxu0 %v2093_v7  ;;  %v2161_v7 = vld [vmem:[%s2497_s4 + $0x90] ss:$8 sps:$4 sm:$0xff]  }
  0x73   : > { %604 = vmatpush1.bf16.msra.mxu1 %v2094_v9  ;;  %v2169_v9 = vld [vmem:[%s2497_s4 + $0xa4] ss:$8 sps:$4 sm:$0xff]  }
  0x74   : > { %980 = vmatpush1.bf16.msra.mxu0 %v2091_v8  ;;  %605 = vmatprep.subr.bf16.mxu1 %v2095_v11  ;;  %v2164_v8 = vld [vmem:[%s2497_s4 + $0x390] ss:$8 sps:$4 sm:$0xff]   ;;  %v2167_v11 = vld [vmem:[%s2497_s4 + $0xa0] ss:$8 sps:$4 sm:$0xff]  }
  0x75   : > { %981 = vmatprep.subr.bf16.mxu0 %v2099_v12  ;;  %v2170_v12 = vld [vmem:[%s2497_s4 + $0x3a0] ss:$8 sps:$4 sm:$0xff]  }
  0x77   : > { %606 = vmatpush1.bf16.msra.mxu1 %v2100_v14  ;;  %v2178_v14 = vld [vmem:[%s2497_s4 + $0x3b4] ss:$8 sps:$4 sm:$0xff]  }
  0x78   : > { %982 = vmatpush1.bf16.msra.mxu0 %v2097_v13  ;;  %607 = vmatprep.subr.bf16.mxu1 %v2101_v16  ;;  %v2175_v13 = vld [vmem:[%s2497_s4 + $0xb4] ss:$8 sps:$4 sm:$0xff]   ;;  %v2176_v16 = vld [vmem:[%s2497_s4 + $0x3b0] ss:$8 sps:$4 sm:$0xff]  }
  0x79   : > { %983 = vmatprep.subr.bf16.mxu0 %v2105_v17  ;;  %v2181_v17 = vld [vmem:[%s2497_s4 + $0xc4] ss:$8 sps:$4 sm:$0xff]  }
  0x7b   : > { %608 = vmatpush1.bf16.msra.mxu1 %v2106_v19  ;;  %v2179_v19 = vld [vmem:[%s2497_s4 + $0xc0] ss:$8 sps:$4 sm:$0xff]  }
  0x7c   : > { %984 = vmatpush1.bf16.msra.mxu0 %v2103_v18  ;;  %928 = vmatprep.subr.bf16.mxu1 %v2109_v21  ;;  %v2184_v18 = vld [vmem:[%s2497_s4 + $0x3c4] ss:$8 sps:$4 sm:$0xff]   ;;  %v2182_v21 = vld [vmem:[%s2497_s4 + $0x3c0] ss:$8 sps:$4 sm:$0xff]  }
  0x7d   : > { %1333 = vmatprep.subr.bf16.mxu0 %v2112_v22  ;;  %v2187_v22 = vld [vmem:[%s2497_s4 + $0xd4] ss:$8 sps:$4 sm:$0xff]  }
  0x7e   : > { %610 = vmatmul.mubr.bf16.vlgmr.msra.gmra.mrb[0].mxu1 %v2551_v42  ;;  %v2133_v42 = vld [vmem:[%s2497_s4 + $0x44] ss:$8 sps:$4 sm:$0xff]  }
  0x7f   : > { %1002 = vmatmul.mubr.bf16.vlgmr.msra.gmra.mrb[4].mxu0 %v684_v26  ;;  %929 = vmatpush1.bf16.msra.mxu1 %v2107_v24  ;;  %v2185_v24 = vld [vmem:[%s2497_s4 + $0xd0] ss:$8 sps:$4 sm:$0xff]   ;;  %v2193_v26 = vld [vmem:[%s2497_s4 + $0xe4] ss:$8 sps:$4 sm:$0xff]  }
  0x80   : > { %1334 = vmatpush1.bf16.msra.mxu0 %v2110_v25  ;;  %930 = vmatprep.subr.bf16.mxu1 %v2115_v28  ;;  %v2188_v25 = vld [vmem:[%s2497_s4 + $0x3d0] ss:$8 sps:$4 sm:$0xff]   ;;  %v2196_v28 = vld [vmem:[%s2497_s4 + $0x3e4] ss:$8 sps:$4 sm:$0xff]  }
  0x81   : > { %1335 = vmatprep.subr.bf16.mxu0 %v2118_v29  ;;  %960 = vmatprep.mubr.bf16.mxu1 %v683_v30  ;;  %v2191_v29 = vld [vmem:[%s2497_s4 + $0xe0] ss:$8 sps:$4 sm:$0xff]  }
  0x82   : > { %1365 = vmatprep.mubr.bf16.mxu0 %v1088_v2  ;;  %v2194_v30 = vld [vmem:[%s2497_s4 + $0x3e0] ss:$8 sps:$4 sm:$0xff]  }
  0x83   : > { %931 = vmatpush1.bf16.msra.mxu1 %v2113_v31  ;;  %v2199_v31 = vld [vmem:[%s2497_s4 + $0xf4] ss:$8 sps:$4 sm:$0xff]  }
  0x84   : > { %1336 = vmatpush1.bf16.msra.mxu0 %v2116_v33  ;;  %932 = vmatprep.subr.bf16.mxu1 %v2121_v34  ;;  %v2202_v33 = vld [vmem:[%s2497_s4 + $0x3f4] ss:$8 sps:$4 sm:$0xff]   ;;  %v2197_v34 = vld [vmem:[%s2497_s4 + $0xf0] ss:$8 sps:$4 sm:$0xff]  }
  0x85   : > { %1337 = vmatprep.subr.bf16.mxu0 %v2124_v35  ;;  %v2200_v35 = vld [vmem:[%s2497_s4 + $0x3f0] ss:$8 sps:$4 sm:$0xff]  }
  0x87   : > { %933 = vmatpush1.bf16.msra.mxu1 %v2119_v36  ;;  %v2205_v36 = vld [vmem:[%s2497_s4 + $0x404] ss:$8 sps:$4 sm:$0xff]  }
  0x88   : > { %1338 = vmatpush1.bf16.msra.mxu0 %v2122_v37  ;;  %934 = vmatprep.subr.bf16.mxu1 %v2127_v38  ;;  %v1081_v37 = vrot.slane %v2633_v59, %v2540_v32  ;;  %v2203_v38 = vld [vmem:[%s2497_s4 + $0x400] ss:$8 sps:$4 sm:$0xff]  }
  0x89   : > { %1339 = vmatprep.subr.bf16.mxu0 %v2130_v39  ;;  %v2208_v39 = vld [vmem:[%s2497_s4 + $0x414] ss:$8 sps:$4 sm:$0xff]  }
  0x8b   : > { %935 = vmatpush1.bf16.msra.mxu1 %v2125_v40  ;;  %v2206_v40 = vld [vmem:[%s2497_s4 + $0x410] ss:$8 sps:$4 sm:$0xff]  }
  0x8c   : > { %1340 = vmatpush1.bf16.msra.mxu0 %v2128_v41  ;;  %936 = vmatprep.subr.bf16.mxu1 %v2133_v42  ;;  %v2211_v41 = vld [vmem:[%s2497_s4 + $0x424] ss:$8 sps:$4 sm:$0xff]   ;;  %v2209_v42 = vld [vmem:[%s2497_s4 + $0x420] ss:$8 sps:$4 sm:$0xff]  }
  0x8d   : > { %1341 = vmatprep.subr.bf16.mxu0 %v2136_v43  ;;  %v2214_v43 = vld [vmem:[%s2497_s4 + $0x434] ss:$8 sps:$4 sm:$0xff]  }
  0x8f   : > { %937 = vmatpush1.bf16.msra.mxu1 %v2131_v44  ;;  %v2212_v44 = vld [vmem:[%s2497_s4 + $0x430] ss:$8 sps:$4 sm:$0xff]  }
  0x90   : > { %1342 = vmatpush1.bf16.msra.mxu0 %v2134_v45  ;;  %938 = vmatprep.subr.bf16.mxu1 %v2139_v46  ;;  %v2215_v45 = vld [vmem:[%s2497_s4 + $0x440] ss:$8 sps:$4 sm:$0xff]   ;;  %v2220_v46 = vld [vmem:[%s2497_s4 + $0x454] ss:$8 sps:$4 sm:$0xff]  }
  0x91   : > { %1343 = vmatprep.subr.bf16.mxu0 %v2142_v47  ;;  %v2223_v47 = vld [vmem:[%s2497_s4 + $0x464] ss:$8 sps:$4 sm:$0xff]  }
  0x93   : > { %939 = vmatpush1.bf16.msra.mxu1 %v2137_v48  ;;  %v2221_v48 = vld [vmem:[%s2497_s4 + $0x460] ss:$8 sps:$4 sm:$0xff]  }
  0x94   : > { %1344 = vmatpush1.bf16.msra.mxu0 %v2140_v49  ;;  %940 = vmatprep.subr.bf16.mxu1 %v2145_v50  ;;  %v2226_v49 = vld [vmem:[%s2497_s4 + $0x474] ss:$8 sps:$4 sm:$0xff]   ;;  %v2224_v50 = vld [vmem:[%s2497_s4 + $0x470] ss:$8 sps:$4 sm:$0xff]  }
  0x95   : > { %1345 = vmatprep.subr.bf16.mxu0 %v2148_v51  ;;  %v1089_v51 = vcombine.high %v1081_v37, %v1081_v37 }
  0x97   : > { %941 = vmatpush1.bf16.msra.mxu1 %v2143_v54 }
  0x98   : > { %1346 = vmatpush1.bf16.msra.mxu0 %v2146_v55  ;;  %942 = vmatprep.subr.bf16.mxu1 %v2151_v57 }
  0x99   : > { %1347 = vmatprep.subr.bf16.mxu0 %v2154_v58 }
  0x9b   : > { %943 = vmatpush1.bf16.msra.mxu1 %v2149_v60 }
  0x9c   : > { %1348 = vmatpush1.bf16.msra.mxu0 %v2152_v61  ;;  %944 = vmatprep.subr.bf16.mxu1 %v2157_v63 }
  0x9d   : > { %1349 = vmatprep.subr.bf16.mxu0 %v2160_v1 }
  0x9f   : > { %945 = vmatpush1.bf16.msra.mxu1 %v2155_v3 }
  0xa0   : > { %1350 = vmatpush1.bf16.msra.mxu0 %v2158_v4  ;;  %946 = vmatprep.subr.bf16.mxu1 %v2163_v5  ;;  %v2346_v5 = vmov 1983009808  }
  0xa1   : > { %1351 = vmatprep.subr.bf16.mxu0 %v2166_v6  ;;  %v1421_v6 = vunpack.c.l.s4 %v2346_v5 }
  0xa3   : > { %947 = vmatpush1.bf16.msra.mxu1 %v2161_v7  ;;  %v1422_v7 = vunpack.c.0.s8 %v1421_v6 }
  0xa4   : > { %1352 = vmatpush1.bf16.msra.mxu0 %v2164_v8  ;;  %948 = vmatprep.subr.bf16.mxu1 %v2169_v9 }
  0xa5   : > { %1353 = vmatprep.subr.bf16.mxu0 %v2172_v10 }
  0xa7   : > { %949 = vmatpush1.bf16.msra.mxu1 %v2167_v11 }
  0xa8   : > { %1354 = vmatpush1.bf16.msra.mxu0 %v2170_v12  ;;  %950 = vmatprep.subr.bf16.mxu1 %v2175_v13  ;;  %v1425_v12 = vsub.s32 %v1422_v7, %v2528_v27 }
  0xa9   : > { %1355 = vmatprep.subr.bf16.mxu0 %v2178_v14 }
  0xab   : > { %951 = vmatpush1.bf16.msra.mxu1 %v2173_v15 }
  0xac   : > { %1356 = vmatpush1.bf16.msra.mxu0 %v2176_v16  ;;  %952 = vmatprep.subr.bf16.mxu1 %v2181_v17 }
  0xad   : > { %1357 = vmatprep.subr.bf16.mxu0 %v2184_v18 }
  0xaf   : > { %953 = vmatpush1.bf16.msra.mxu1 %v2179_v19 }
  0xb0   : > { %1358 = vmatpush1.bf16.msra.mxu0 %v2182_v21  ;;  %954 = vmatprep.subr.bf16.mxu1 %v2187_v22 }
  0xb1   : > { %1359 = vmatprep.subr.bf16.mxu0 %v2190_v23 }
  0xb3   : > { %955 = vmatpush1.bf16.msra.mxu1 %v2185_v24 }
  0xb4   : > { %1360 = vmatpush1.bf16.msra.mxu0 %v2188_v25  ;;  %956 = vmatprep.subr.bf16.mxu1 %v2193_v26 }
  0xb5   : > { %1361 = vmatprep.subr.bf16.mxu0 %v2196_v28 }
  0xb7   : > { %957 = vmatpush1.bf16.msra.mxu1 %v2191_v29 }
  0xb8   : > { %1362 = vmatpush1.bf16.msra.mxu0 %v2194_v30  ;;  %958 = vmatprep.subr.bf16.mxu1 %v2199_v31 }
  0xb9   : > { %1363 = vmatprep.subr.bf16.mxu0 %v2202_v33 }
  0xbb   : > { %959 = vmatpush1.bf16.msra.mxu1 %v2197_v34 }
  0xbc   : > { %1364 = vmatpush1.bf16.msra.mxu0 %v2200_v35 }
  0xbd   : > { %1374 = vmatprep.subr.bf16.mxu0 %v2205_v36 }
  0xbe   : > { %961 = vmatmul.mubr.bf16.vlgmr.msra.gmra.mrb[4].mxu1 %v2594_v20  ;;  %v2217_v20 = vld [vmem:[%s2497_s4 + $0x444] ss:$8 sps:$4 sm:$0xff]  }
  0xbf   : > { %1366 = vmatmul.mubr.bf16.vlgmr.msra.gmra.mrb[4].mxu0 %v1081_v37 }
  0xc0   : > { %1375 = vmatpush1.bf16.msra.mxu0 %v2203_v38  ;;  %1406 = vmatprep.mubr.bf16.mxu0 %v2344_v0  ;;  %v2218_v0 = vld [vmem:[%s2497_s4 + $0x450] ss:$8 sps:$4 sm:$0xff]  }
  0xc1   : > { %1376 = vmatprep.subr.bf16.mxu0 %v2208_v39 }
  0xc4   : > { %1377 = vmatpush1.bf16.msra.mxu0 %v2206_v40 }
  0xc5   : > { %1378 = vmatprep.subr.bf16.mxu0 %v2211_v41 }
  0xc8   : > { %1379 = vmatpush1.bf16.msra.mxu0 %v2209_v42 }
  0xc9   : > { %1380 = vmatprep.subr.bf16.mxu0 %v2214_v43 }
  0xcc   : > { %1381 = vmatpush1.bf16.msra.mxu0 %v2212_v44 }
  0xcd   : > { %1382 = vmatprep.subr.bf16.mxu0 %v2217_v20 }
  0xd0   : > { %1383 = vmatpush1.bf16.msra.mxu0 %v2215_v45 }
  0xd1   : > { %1384 = vmatprep.subr.bf16.mxu0 %v2220_v46 }
  0xd4   : > { %1385 = vmatpush1.bf16.msra.mxu0 %v2218_v0 }
  0xd5   : > { %1386 = vmatprep.subr.bf16.mxu0 %v2223_v47 }
  0xd8   : > { %1387 = vmatpush1.bf16.msra.mxu0 %v2221_v48 }
  0xd9   : > { %1388 = vmatprep.subr.bf16.mxu0 %v2226_v49 }
  0xdc   : > { %1389 = vmatpush1.bf16.msra.mxu0 %v2224_v50 }
  0xdf   : > { %1407 = vmatmul.mubr.bf16.vlgmr.msra.gmra.mrb[4].mxu0 %v1089_v51 }
 0x132   : > { %v652_v52 = vpop.f32.mrb[0].mxu0 }
 0x133   : > { %v654_v53 = vpop.f32.mrb[1].mxu0 }
 0x134   : > { %v656_v54 = vpop.f32.mrb[2].mxu0 }
 0x135   : > { %v657_v55 = vpop.f32.mrb[3].mxu0 }
 0x151   : > { %v611_v56 = vpop.f32.mrb[0].mxu1 }
 0x152   : > { %v653_v57 = vadd.f32 %v652_v52, %v611_v56  ;;  %v613_v58 = vpop.f32.mrb[1].mxu1 }
 0x153   : > { %v655_v59 = vadd.f32 %v654_v53, %v613_v58  ;;  %v615_v60 = vpop.f32.mrb[2].mxu1 }
 0x154   : > { %v616_v61 = vpop.f32.mrb[3].mxu1 }
 0x191   : > { %v962_v62 = vpop.f32.mrb[4].mxu1 }
 0x192   : > { %v963_v63 = vadd.f32 %v962_v62, %v653_v57  ;;  %v964_v1 = vpop.f32.mrb[5].mxu1 }
 0x193   : > { %v965_v2 = vadd.f32 %v964_v1, %v655_v59  ;;  %v966_v3 = vpop.f32.mrb[6].mxu1 }
 0x194   : > { %v967_v4 = vpop.f32.mrb[7].mxu1 }
 0x1b2   : > { %v1408_v8 = vpop.f32.mrb[4].mxu0 }
 0x1b3   : > { %v1903_v9 = vadd.f32 %v1408_v8, %v963_v63  ;;  %v1410_v10 = vpop.f32.mrb[5].mxu0 }
 0x1b4   : > { %v1906_v11 = vadd.f32 %v1410_v10, %v965_v2  ;;  %v1412_v13 = vpop.f32.mrb[6].mxu0 }
 0x1b5   : > { %v1413_v14 = vpop.f32.mrb[7].mxu0 }
 0x1b6   : > { %v1419_v15 = vcombine.low %v1903_v9, %v1906_v11 }
 0x1b8   : > { %v1426_v16 = vrot.slane %v1419_v15, %v1425_v12 }
 0x1ba   : > { %v1427_v17 = vcombine.high %v1426_v16, %v1426_v16  ;;  %v1434_v18 = vrot.slane %v1426_v16, %v1425_v12 }
 0x1bc   : > { %v1435_v19 = vcombine.high %v1434_v18, %v1434_v18  ;;  %v1442_v21 = vrot.slane %v1427_v17, %v1425_v12 }
 0x1be   : > { %v1443_v22 = vcombine.high %v1442_v21, %v1442_v21  ;;  %v1890_v23 = vpack.c.bf16 %v1435_v19, %v1434_v18  ;;  %1496 = sbr.rel (!%p2741_p12) target bundleno = 461 (0x1cd), region = 36 }
 0x1c0   : > { %v1463_v24 = vrot.slane %v1890_v23, %v2540_v32  ;;  %v1891_v25 = vpack.c.bf16 %v1443_v22, %v1442_v21 }
 0x1c2   : > { %v1478_v26 = vrot.slane %v1891_v25, %v2540_v32  ;;  %1892 = vst.sshfl [vmem:[%s193_s27] sm:$0x5 pattern:$0x73625140] %v1463_v24 }
 0x1c4   : > { %1893 = vst.sshfl [vmem:[%s193_s27 + $0x2] sm:$0x5 pattern:$0x73625140] %v1478_v26 }
 0x1c9   : > { %v1518_v27 = vld [vmem:[%s193_s27] sm:$0x3] }
 0x1ca   : > { %1519 = vst [vmem:[%s1502_s5] sm:$0x3] %v1518_v27 }
 0x1cb   : > { %v1520_v28 = vld [vmem:[%s193_s27 + $0x2] sm:$0x3] }
 0x1cc   : > { %1521 = vst [vmem:[%s1502_s5 + $0x10] sm:$0x3] %v1520_v28 }
 0x1cd PF: > { %s15_s18 = sadd.s32 1, %s2339_s18   ;;  %s2742_s9 = smov %s2307_s10 }
 0x1ce   : > { %p12_p0 = scmp.ge.s32.totalorder %s15_s18, 18   ;;  %s2743_s10 = smov %s2442_s30 }
 0x1cf   : > { %s2744_s11 = smov %s2315_s12  ;;  %s2745_s12 = smov %s2319_s13 }
 0x1d0   : > { %s2746_s13 = smov %s2430_s25  ;;  %s2747_s14 = smov %s2331_s16 }
 0x1d1   : > { %s2748_s15 = smov %s2335_s17  ;;  %s2749_s16 = smov %s2752_s20 }
 0x1d2   : > { %s2750_s17 = smov %s2756_s21  ;;  %14 = sbr.rel (!%p12_p0) target bundleno = 6 (0x6), region = 110 }
 0x1d9   :  { %1550 = vsyncpa [#allocation3], 1 }
 0x1da   :  { %1552 = vsyncpa [#allocation3 + $0x1], 1 }

// kernel: image_decoder_forward.9
= control target key start
LH: loop header
LB: loop body
LE: loop exit
PB: predicated region body
PF: predicated region fallthrough
CT: control target
= control target key end

     0   :  { %s597_s12 = smov 0   ;;  %s599_s13 = smov 0   ;;  %s640_s0 = inlined_call_operand.vmem [shape: bf16[2,16,512], index: 0, kind: input, shape index: {}]   ;;  %s641_s1 = inlined_call_operand.vmem [shape: f32[1,512], index: 1, kind: input, shape index: {}]   ;;  %s642_s2 = inlined_call_operand.vmem [shape: f32[1,512], index: 2, kind: input, shape index: {}]   ;;  %s643_s3 = inlined_call_operand.vmem [shape: f32[2,16,512], index: 3, kind: output, shape index: {}]  }
   0x1   :  { %s601_s14 = smov 0  }
   0x2 LB: > { %s32_s15 = sadd.s32 1, %s571_s13  ;;  %p520_p0 = scmp.ge.s32.totalorder %s575_s14, 1  ;;  %s575_s14 = sphi %s601_s14, %s13_s14   ;;  %s571_s13 = sphi %s599_s13, %s645_s13   ;;  %s567_s12 = sphi %s597_s12, %s644_s12  }
   0x3   : > { %p34_p1 = scmp.ge.s32.totalorder %s32_s15, 2  ;;  %p195_p2 = scmp.lt.s32.totalorder %s575_s14, 3 }
   0x5   : > { %s647_s15 = smov (%p34_p1, %s32_s15), 0  ;;  %p196_p3 = pnand %p520_p0, %p195_p2 }
   0x6   : > { %p247_p4 = scmp.lt.s32.totalorder (!%p196_p3), %s567_s12, 1  ;;  %v301_v0 = vlaneseq (!%p196_p3)  ;;  %v299_v2 = vld [vmem:[%s641_s1] sm:$0xf] (!%p196_p3) }
   0x7   : > { %199 = sbr.rel (%p196_p3) target bundleno = 30 (0x1e), region = 32  ;;  %v329_v3 = vld [vmem:[%s642_s2] sm:$0xf] (!%p196_p3) }
   0x8   : > { %v302_v1 = vshrl.u32 (!%p196_p3), %v301_v0, 7 }
   0xa   : > { %v303_v4 = vsub.s32 (!%p196_p3), 0, %v302_v1  ;;  %v307_v5 = vsub.s32 (!%p196_p3), 1, %v302_v1  ;;  %v311_v6 = vsub.s32 (!%p196_p3), 2, %v302_v1  ;;  %v315_v7 = vsub.s32 (!%p196_p3), 3, %v302_v1 }
   0xc   : > { %v304_v9 = vrot.slane (!%p196_p3), %v299_v2, %v303_v4  ;;  %v334_v10 = vrot.slane (!%p196_p3), %v329_v3, %v303_v4  ;;  %v308_v11 = vrot.slane (!%p196_p3), %v299_v2, %v307_v5  ;;  %v338_v12 = vrot.slane (!%p196_p3), %v329_v3, %v307_v5 }
   0xd   : > { %v312_v18 = vrot.slane (!%p196_p3), %v299_v2, %v311_v6  ;;  %v342_v20 = vrot.slane (!%p196_p3), %v329_v3, %v311_v6  ;;  %v316_v22 = vrot.slane (!%p196_p3), %v299_v2, %v315_v7  ;;  %v346_v23 = vrot.slane (!%p196_p3), %v329_v3, %v315_v7 }
   0xe   : > { %s649_s12 = smov (!%p247_p4, %s567_s12), 1 }
   0xf   : > { %s527_s20 = sshll.u32 %s649_s12, 5  ;;  %s528_s24 = sshll.u32 %s649_s12, 6 }
  0x10   : > { %s258_s23 = scalar_lea.vmem %s640_s0, %s527_s20  ;;  %s284_s27 = scalar_lea.vmem %s643_s3, %s528_s24 }
  0x11   : > { %v287_v8 = vld [vmem:[%s258_s23] sm:$0xff]  ;;  %v288_v13 = vld [vmem:[%s258_s23 + $0x8] sm:$0xff]  ;;  %v289_v14 = vld [vmem:[%s258_s23 + $0x10] sm:$0xff] }
  0x12   : > { %v291_v15 = vunpack.c.l.bf16 %v287_v8  ;;  %v292_v16 = vunpack.c.h.bf16 %v287_v8  ;;  %v293_v17 = vunpack.c.l.bf16 %v288_v13  ;;  %v290_v19 = vld [vmem:[%s258_s23 + $0x18] sm:$0xff]  ;;  %v294_v21 = vunpack.c.h.bf16 %v288_v13 }
  0x13   : > { %v295_v27 = vunpack.c.l.bf16 %v289_v14  ;;  %v296_v29 = vunpack.c.h.bf16 %v289_v14  ;;  %v297_v30 = vunpack.c.l.bf16 %v290_v19  ;;  %v298_v31 = vunpack.c.h.bf16 %v290_v19 }
  0x14   : > { %v321_v24 = vmul.f32 %v304_v9, %v291_v15  ;;  %v322_v25 = vmul.f32 %v308_v11, %v292_v16  ;;  %v323_v26 = vmul.f32 %v312_v18, %v293_v17  ;;  %v324_v28 = vmul.f32 %v316_v22, %v294_v21 }
  0x15   : > { %v325_v35 = vmul.f32 %v304_v9, %v295_v27  ;;  %v326_v37 = vmul.f32 %v308_v11, %v296_v29  ;;  %v327_v38 = vmul.f32 %v312_v18, %v297_v30  ;;  %v328_v39 = vmul.f32 %v316_v22, %v298_v31 }
  0x16   : > { %v351_v32 = vadd.f32 %v334_v10, %v321_v24  ;;  %v352_v33 = vadd.f32 %v338_v12, %v322_v25  ;;  %v353_v34 = vadd.f32 %v342_v20, %v323_v26  ;;  %v354_v36 = vadd.f32 %v346_v23, %v324_v28 }
  0x17   : > { %v355_v43 = vadd.f32 %v334_v10, %v325_v35  ;;  %v356_v45 = vadd.f32 %v338_v12, %v326_v37  ;;  %v357_v46 = vadd.f32 %v342_v20, %v327_v38  ;;  %v358_v47 = vadd.f32 %v346_v23, %v328_v39 }
  0x18   : > { %v359_v40 = vmax.f32 %v351_v32, 0.0  ;;  %v360_v41 = vmax.f32 %v352_v33, 0.0  ;;  %v361_v42 = vmax.f32 %v353_v34, 0.0  ;;  %v362_v44 = vmax.f32 %v354_v36, 0.0 }
  0x19   : > { %v363_v48 = vmax.f32 %v355_v43, 0.0  ;;  %v364_v49 = vmax.f32 %v356_v45, 0.0  ;;  %v365_v50 = vmax.f32 %v357_v46, 0.0  ;;  %v366_v51 = vmax.f32 %v358_v47, 0.0 }
  0x1a   : > { %367 = vst [vmem:[%s284_s27] sm:$0xff] %v359_v40  ;;  %368 = vst [vmem:[%s284_s27 + $0x8] sm:$0xff] %v360_v41 }
  0x1b   : > { %369 = vst [vmem:[%s284_s27 + $0x10] sm:$0xff] %v361_v42  ;;  %370 = vst [vmem:[%s284_s27 + $0x18] sm:$0xff] %v362_v44 }
  0x1c   : > { %371 = vst [vmem:[%s284_s27 + $0x20] sm:$0xff] %v363_v48  ;;  %372 = vst [vmem:[%s284_s27 + $0x28] sm:$0xff] %v364_v49 }
  0x1d   : > { %373 = vst [vmem:[%s284_s27 + $0x30] sm:$0xff] %v365_v50  ;;  %374 = vst [vmem:[%s284_s27 + $0x38] sm:$0xff] %v366_v51 }
  0x1e PF: > { %s13_s14 = sadd.s32 1, %s575_s14   ;;  %s644_s12 = smov %s571_s13 }
  0x1f   : > { %p10_p5 = scmp.ge.s32.totalorder %s13_s14, 4   ;;  %s645_s13 = smov %s647_s15 }
  0x21   :  { %12 = sbr.rel (!%p10_p5) target bundleno = 2 (0x2), region = 68 }

</bundles_post_ra>
